<compile_context>
chip_gen: v5e
topology: v5e:2x2
jax: 0.10.0
libtpu: 0.0.40
codegen_flags: <defaults>
</compile_context>

<pallas_src>
import functools
import math

import jax
import jax.numpy as jnp
import numpy as np
from jax.experimental import pallas as pl
from jax.experimental.pallas import tpu as pltpu

_LN_EPS = 1e-5
_SEQ_ALIGN = 16                      # bf16 vregs pack 16 sublane rows
_VMEM_LIMIT = 32 * 1024 * 1024       # safe on v5e/v6e/v7x for these tile sizes


def _round_up(x, m):
    return (x + m - 1) // m * m


def _layernorm(x, gamma, beta):
    mu = jnp.mean(x, axis=-1, keepdims=True)
    xc = x - mu
    var = jnp.mean(xc * xc, axis=-1, keepdims=True)
    return xc * jax.lax.rsqrt(var + _LN_EPS) * gamma + beta


def _gelu_tanh(x):
    # TODO(synk): PyTorch nn.GELU() defaults to the exact erf form; the tanh
    # approximation differs by <1e-3 absolute (erf is not reliably lowerable).
    c = math.sqrt(2.0 / math.pi)
    return 0.5 * x * (1.0 + jnp.tanh(c * (x + 0.044715 * (x * x * x))))


# ---------------------------------------------------------------------------
# Weight BlockSpecs: grid-invariant, single-buffered when supported.
# ---------------------------------------------------------------------------
_SINGLE_BUFFER_OK = None


def _single_buffer_supported():
    """True iff this JAX/Mosaic build accepts pl.Buffered(1) input specs."""
    global _SINGLE_BUFFER_OK
    if _SINGLE_BUFFER_OK is not None:
        return _SINGLE_BUFFER_OK
    ok = False
    if hasattr(pl, "Buffered"):
        def _copy(x_ref, o_ref):
            o_ref[...] = x_ref[...]
        try:
            fn = pl.pallas_call(
                _copy,
                out_shape=jax.ShapeDtypeStruct((8, 128), jnp.float32),
                grid=(2,),
                in_specs=[pl.BlockSpec((8, 128), lambda i: (0, 0),
                                       pipeline_mode=pl.Buffered(1))],
                out_specs=pl.BlockSpec((8, 128), lambda i: (0, 0)),
            )
            jax.block_until_ready(fn(jnp.zeros((8, 128), jnp.float32)))
            ok = True
        except Exception:   # pragma: no cover - fall back to default buffering
            ok = False
    _SINGLE_BUFFER_OK = ok
    return ok


def _weight_spec(arr):
    """Whole-array, grid-invariant BlockSpec.  Weights never change across the
    batch grid, so the second pipeline buffer is pure VMEM waste when
    single-buffering is available."""
    zeros = (0,) * arr.ndim
    index_map = lambda b, _z=zeros: _z          # noqa: E731
    if _single_buffer_supported():
        return pl.BlockSpec(arr.shape, index_map, pipeline_mode=pl.Buffered(1))
    return pl.BlockSpec(arr.shape, index_map)


def _pick_batch_tile(batch, rows_per_image, *, max_rows=512, min_steps=2):
    """Largest divisor `bt` of `batch` with bt*rows_per_image <= max_rows while
    keeping >= min_steps 'parallel' grid steps (v7x has 2 TensorCores)."""
    best = 1
    for bt in range(1, batch + 1):
        if batch % bt:
            continue
        if bt * rows_per_image > max_rows:
            continue
        if batch >= min_steps and batch // bt < min_steps:
            continue
        best = bt
    return best


# ---------------------------------------------------------------------------
# Patch embedding kernel: (rows, K) @ (K, E) + add, one aligned full store.
# The wrapper pads the patch rows with a zero row for the CLS slot and zero
# rows up to n_pad, and `add` carries cls+pos[0] / conv_bias+pos[1:] / zeros.
# ---------------------------------------------------------------------------
def _patch_embed_kernel(p_ref, w_ref, add_ref, o_ref):
    bt, n_pad, k = p_ref.shape
    e = w_ref.shape[1]
    rows = bt * n_pad
    proj = jnp.dot(p_ref[...].reshape(rows, k), w_ref[...],
                   preferred_element_type=jnp.float32)
    o_ref[...] = (proj.reshape(bt, n_pad, e) + add_ref[...]).astype(o_ref.dtype)


def patch_embed_pallas(patches, w_pe, add, *, out_dtype):
    B, n_pad, K = patches.shape
    E = w_pe.shape[1]
    bt = _pick_batch_tile(B, n_pad)

    def _bytes(a):
        return int(a.size) * a.dtype.itemsize

    cost = pl.CostEstimate(
        flops=2 * B * n_pad * K * E,
        transcendentals=0,
        bytes_accessed=_bytes(patches) + _bytes(w_pe) + _bytes(add)
        + B * n_pad * E * jnp.dtype(out_dtype).itemsize)

    return pl.pallas_call(
        _patch_embed_kernel,
        out_shape=jax.ShapeDtypeStruct((B, n_pad, E), out_dtype),
        grid_spec=pltpu.PrefetchScalarGridSpec(
            num_scalar_prefetch=0,
            grid=(B // bt,),
            in_specs=[pl.BlockSpec((bt, n_pad, K), lambda b: (b, 0, 0)),
                      _weight_spec(w_pe),
                      _weight_spec(add)],
            out_specs=pl.BlockSpec((bt, n_pad, E), lambda b: (b, 0, 0)),
        ),
        compiler_params=pltpu.CompilerParams(
            dimension_semantics=("parallel",),
            vmem_limit_bytes=_VMEM_LIMIT),
        cost_estimate=cost,
    )(patches, w_pe, add)


# ---------------------------------------------------------------------------
# Fused transformer-encoder block kernel (LN1 + MHSA + res + LN2 + MLP + res).
# ---------------------------------------------------------------------------
def _encoder_block_kernel(x_ref, g1_ref, b1_ref, wqkv_ref, bqkv_ref,
                          wo_ref, bo_ref, g2_ref, b2_ref,
                          w1_ref, c1_ref, w2_ref, c2_ref,
                          o_ref, *, num_heads, n_real, compute_dtype):
    bt, n_pad, emb = x_ref.shape
    heads = num_heads
    dh = emb // heads
    rows = bt * n_pad
    cdt = compute_dtype

    x = x_ref[...].astype(jnp.float32).reshape(rows, emb)

    # ---- LayerNorm 1 + fused lane-dense QKV projection ---------------------
    xn1 = _layernorm(x, g1_ref[...], b1_ref[...]).astype(cdt)
    qkv = jnp.dot(xn1, wqkv_ref[...],
                  preferred_element_type=jnp.float32) + bqkv_ref[...]  # (rows, 3E)

    # Head split: static lane slices + leading-axis concat (group = h*bt + b).
    # (No 3-D transpose: Mosaic only guarantees minor-dim transposes.)
    def _split_heads(base):
        parts = [qkv[:, base + h * dh: base + (h + 1) * dh]
                 .reshape(bt, n_pad, dh) for h in range(heads)]
        return jnp.concatenate(parts, axis=0).astype(cdt)   # (heads*bt, Np, dh)

    q = _split_heads(0)             # 1/sqrt(dh) folded into wqkv/bqkv columns
    k = _split_heads(emb)
    v = _split_heads(2 * emb)

    # ---- attention with f32 softmax ----------------------------------------
    s = jnp.einsum('gnd,gmd->gnm', q, k,
                   preferred_element_type=jnp.float32)       # (heads*bt, Np, Np)
    if n_real < n_pad:
        col = jax.lax.broadcasted_iota(jnp.int32, (1, 1, n_pad), 2)
        s = jnp.where(col < n_real, s, -1e30)                # mask padded keys
    s = s - jnp.max(s, axis=-1, keepdims=True)
    p = jnp.exp(s)
    attn = (p / jnp.sum(p, axis=-1, keepdims=True)).astype(cdt)

    ctx = jnp.einsum('gnm,gmd->gnd', attn, v,
                     preferred_element_type=jnp.float32)     # (heads*bt, Np, dh)

    # Head merge -> (rows, E), then ONE lane-dense output projection.
    ctx = jnp.concatenate(
        [ctx[h * bt:(h + 1) * bt].reshape(rows, dh) for h in range(heads)],
        axis=-1).astype(cdt)
    y = jnp.dot(ctx, wo_ref[...], preferred_element_type=jnp.float32) + bo_ref[...]

    x1 = x + y                                               # residual 1 (f32)

    # ---- LayerNorm 2 + MLP (Dropout is identity at inference) --------------
    xn2 = _layernorm(x1, g2_ref[...], b2_ref[...]).astype(cdt)
    h1 = jnp.dot(xn2, w1_ref[...], preferred_element_type=jnp.float32) + c1_ref[...]
    h1 = _gelu_tanh(h1).astype(cdt)
    mlp = jnp.dot(h1, w2_ref[...], preferred_element_type=jnp.float32) + c2_ref[...]

    o_ref[...] = (x1 + mlp).reshape(bt, n_pad, emb).astype(o_ref.dtype)


def encoder_block_pallas(x, layer, *, num_heads, n_real, compute_dtype):
    B, n_pad, E = x.shape
    M = layer['w1'].shape[1]
    H = num_heads
    bt = _pick_batch_tile(B, n_pad)

    kernel = functools.partial(_encoder_block_kernel, num_heads=H,
                               n_real=n_real, compute_dtype=compute_dtype)

    names = ('g1', 'b1', 'wqkv', 'bqkv', 'wo', 'bo', 'g2', 'b2',
             'w1', 'c1', 'w2', 'c2')
    ops = [layer[n] for n in names]

    def _bytes(a):
        return int(a.size) * a.dtype.itemsize

    flops = B * (2 * n_pad * E * 3 * E           # fused QKV projection
                 + 4 * n_pad * n_pad * E         # scores + attn @ v (all heads)
                 + 2 * n_pad * E * E             # output projection
                 + 4 * n_pad * E * M)            # MLP
    cost = pl.CostEstimate(
        flops=int(flops),
        transcendentals=int(B * (H * n_pad * n_pad + n_pad * M)),
        bytes_accessed=2 * _bytes(x) + sum(_bytes(o) for o in ops))

    return pl.pallas_call(
        kernel,
        out_shape=jax.ShapeDtypeStruct((B, n_pad, E), x.dtype),
        grid_spec=pltpu.PrefetchScalarGridSpec(
            num_scalar_prefetch=0,
            grid=(B // bt,),
            in_specs=[pl.BlockSpec((bt, n_pad, E), lambda b: (b, 0, 0))]
                     + [_weight_spec(o) for o in ops],
            out_specs=pl.BlockSpec((bt, n_pad, E), lambda b: (b, 0, 0)),
        ),
        compiler_params=pltpu.CompilerParams(
            dimension_semantics=("parallel",),
            vmem_limit_bytes=_VMEM_LIMIT),
        cost_estimate=cost,
    )(x, *ops)


# ---------------------------------------------------------------------------
# Host-side parameter preparation (PyTorch layout -> kernel layout), done ONCE.
# ---------------------------------------------------------------------------
def _prepare_layer(lp, *, num_heads, compute_dtype):
    E = lp['ln1_w'].shape[0]
    Dh = E // num_heads
    scale = 1.0 / math.sqrt(Dh)

    w_qkv = lp['qkv_w'].T                                    # (E, 3E), y = x @ W.T
    col_scale = jnp.concatenate([jnp.full((E,), scale, jnp.float32),
                                 jnp.ones((2 * E,), jnp.float32)])
    wqkv = (w_qkv * col_scale[None, :]).astype(compute_dtype)    # fold 1/sqrt(Dh)
    bqkv = (lp['qkv_b'] * col_scale).reshape(1, 3 * E).astype(jnp.float32)

    return dict(
        g1=lp['ln1_w'].reshape(1, E).astype(jnp.float32),
        b1=lp['ln1_b'].reshape(1, E).astype(jnp.float32),
        wqkv=wqkv, bqkv=bqkv,
        wo=lp['out_w'].T.astype(compute_dtype),              # (E, E)
        bo=lp['out_b'].reshape(1, E).astype(jnp.float32),
        g2=lp['ln2_w'].reshape(1, E).astype(jnp.float32),
        b2=lp['ln2_b'].reshape(1, E).astype(jnp.float32),
        w1=lp['mlp_w1'].T.astype(compute_dtype),             # (E, M)
        c1=lp['mlp_b1'].reshape(1, -1).astype(jnp.float32),
        w2=lp['mlp_w2'].T.astype(compute_dtype),             # (M, E)
        c2=lp['mlp_b2'].reshape(1, E).astype(jnp.float32),
    )


def prepare_vit_params(params, *, patch_size, num_heads,
                       compute_dtype=jnp.bfloat16):
    """One-time relayout/cast of PyTorch-layout parameters for the kernels."""
    _single_buffer_supported()      # probe eagerly, outside any jit trace

    E = params['cls'].shape[-1]
    N = params['pos'].shape[1]      # number of real tokens (CLS + patches)
    P = N - 1
    n_pad = _round_up(N, _SEQ_ALIGN)
    K = params['patch_w'].shape[1] * patch_size * patch_size

    w_pe = params['patch_w'].reshape(E, K).T.astype(compute_dtype)   # (K, E)
    # Row 0: cls + pos[0]; rows 1..P: conv bias + pos[1:]; padded rows: 0.
    add = jnp.zeros((1, n_pad, E), jnp.float32)
    add = add.at[:, 0, :].set(params['cls'][0, 0] + params['pos'][0, 0])
    add = add.at[:, 1:N, :].set(params['patch_b'][None, :] + params['pos'][0, 1:])

    weights = dict(
        w_pe=w_pe,
        add=add,
        layers=[_prepare_layer(lp, num_heads=num_heads,
                               compute_dtype=compute_dtype)
                for lp in params['layers']],
    )
    cfg = dict(patch_size=patch_size, num_heads=num_heads, n_real=N,
               compute_dtype=compute_dtype)
    return weights, cfg


def vit_forward_pallas(x_img, weights, *, patch_size, num_heads, n_real,
                       compute_dtype=jnp.bfloat16):
    B, Cin, Himg, Wimg = x_img.shape
    ps = patch_size
    K, E = weights['w_pe'].shape
    n_pad = weights['add'].shape[1]
    ph, pw = Himg // ps, Wimg // ps
    P = ph * pw

    # im2col (layout plumbing) + zero rows for the CLS slot / sequence padding,
    # so the patch-embed kernel is one dense matmul + one aligned store.
    xp = x_img.reshape(B, Cin, ph, ps, pw, ps).transpose(0, 2, 4, 1, 3, 5)
    patches = xp.reshape(B, P, Cin * ps * ps)
    patches = jnp.pad(patches, ((0, 0), (1, n_pad - 1 - P), (0, 0)))
    patches = patches.astype(compute_dtype)                  # bf16 DMA bytes

    x = patch_embed_pallas(patches, weights['w_pe'], weights['add'],
                           out_dtype=compute_dtype)          # (B, n_pad, E) bf16

    for layer in weights['layers']:
        x = encoder_block_pallas(x, layer, num_heads=num_heads, n_real=n_real,
                                 compute_dtype=compute_dtype)

    return x[:, 0, :].astype(jnp.float32)                    # CLS embedding (B, E)


# ---------------------------------------------------------------------------
# Parameter init (PyTorch layouts) + pure-JAX f32 reference of the module.
# ---------------------------------------------------------------------------
def init_vit_params(key, *, img_size, patch_size, in_channels, embed_dim,
                    depth, num_heads, mlp_dim):
    del num_heads
    K = in_channels * patch_size * patch_size
    P = (img_size // patch_size) ** 2
    E, M = embed_dim, mlp_dim
    keys = iter(jax.random.split(key, 4 + depth * 8))

    def w(shape, fan_in):
        return jax.random.normal(next(keys), shape, jnp.float32) / math.sqrt(fan_in)

    def b(shape):
        return 0.02 * jax.random.normal(next(keys), shape, jnp.float32)

    params = dict(
        patch_w=w((E, in_channels, patch_size, patch_size), K),
        patch_b=b((E,)),
        cls=b((1, 1, E)),
        pos=b((1, P + 1, E)),
        layers=[],
    )
    for _ in range(depth):
        params['layers'].append(dict(
            ln1_w=jnp.ones((E,), jnp.float32), ln1_b=jnp.zeros((E,), jnp.float32),
            qkv_w=w((3 * E, E), E), qkv_b=b((3 * E,)),
            out_w=w((E, E), E), out_b=b((E,)),
            ln2_w=jnp.ones((E,), jnp.float32), ln2_b=jnp.zeros((E,), jnp.float32),
            mlp_w1=w((M, E), E), mlp_b1=b((M,)),
            mlp_w2=w((E, M), M), mlp_b2=b((E,)),
        ))
    return params


def _layernorm_ref(x, w, b):
    mu = x.mean(-1, keepdims=True)
    var = ((x - mu) ** 2).mean(-1, keepdims=True)
    return (x - mu) / jnp.sqrt(var + _LN_EPS) * w + b


def vit_forward_reference(x_img, params, *, patch_size, num_heads):
    """Pure-JAX f32 forward mirroring the PyTorch module (eval mode)."""
    ps = patch_size
    y = jax.lax.conv_general_dilated(
        x_img, params['patch_w'], window_strides=(ps, ps), padding='VALID',
        dimension_numbers=('NCHW', 'OIHW', 'NCHW'))
    y = y + params['patch_b'][None, :, None, None]
    B, E, ph, pw = y.shape
    tokens = y.reshape(B, E, ph * pw).transpose(0, 2, 1)          # (B, P, E)
    cls = jnp.broadcast_to(params['cls'], (B, 1, E))
    x = jnp.concatenate([cls, tokens], axis=1) + params['pos']

    H = num_heads
    for lp in params['layers']:
        Bx, N, C = x.shape
        Dh = C // H
        xn = _layernorm_ref(x, lp['ln1_w'], lp['ln1_b'])
        qkv = xn @ lp['qkv_w'].T + lp['qkv_b']
        qkv = qkv.reshape(Bx, N, 3, H, Dh).transpose(2, 0, 3, 1, 4)
        q, k, v = qkv[0], qkv[1], qkv[2]
        s = jnp.einsum('bhnd,bhmd->bhnm', q, k) / math.sqrt(Dh)
        a = jax.nn.softmax(s, axis=-1)
        ctx = jnp.einsum('bhnm,bhmd->bhnd', a, v)
        ctx = ctx.transpose(0, 2, 1, 3).reshape(Bx, N, C)
        x = x + (ctx @ lp['out_w'].T + lp['out_b'])
        xn2 = _layernorm_ref(x, lp['ln2_w'], lp['ln2_b'])
        hmid = jax.nn.gelu(xn2 @ lp['mlp_w1'].T + lp['mlp_b1'], approximate=False)
        x = x + (hmid @ lp['mlp_w2'].T + lp['mlp_b2'])
    return x[:, 0]


if __name__ == "__main__":
    # Small shapes consistent with the module's forward.
    img_size, patch_size, in_channels = 16, 4, 3
    embed_dim, depth, num_heads, mlp_dim = 32, 2, 4, 64
    B = 2

    key = jax.random.PRNGKey(0)
    kp, kx = jax.random.split(key)
    params = init_vit_params(kp, img_size=img_size, patch_size=patch_size,
                             in_channels=in_channels, embed_dim=embed_dim,
                             depth=depth, num_heads=num_heads, mlp_dim=mlp_dim)
    x_img = jax.random.normal(kx, (B, in_channels, img_size, img_size),
                              jnp.float32)

    # Weight relayout/casting done ONCE (hoisted out of the forward pass).
    weights, cfg = prepare_vit_params(params, patch_size=patch_size,
                                      num_heads=num_heads)
    fwd = jax.jit(functools.partial(vit_forward_pallas, **cfg))

    out = jax.block_until_ready(fwd(x_img, weights))

    ref = vit_forward_reference(x_img, params, patch_size=patch_size,
                                num_heads=num_heads)
    # bf16 MXU operands + bf16 inter-kernel residual stream + tanh GELU
    # -> slightly looser tolerance than a pure-f32 pipeline.
    np.testing.assert_allclose(np.asarray(out), np.asarray(ref),
                               atol=6e-2, rtol=6e-2)

    print("KERNEL_OK")
</pallas_src>

<mosaic_0001>
module attributes {stable_mosaic.version = 11 : i64} {
  func.func @_copy(%arg0: i32, %arg1: memref<8x128xf32, #tpu.memory_space<vmem>>, %arg2: memref<8x128xf32, #tpu.memory_space<vmem>>) attributes {dimension_semantics = [#tpu.dimension_semantics<arbitrary>], iteration_bounds = array<i64: 2>, scalar_prefetch = 0 : i64, scratch_operands = 0 : i64, tpu.core_type = #tpu.core_type<tc>, window_params = [{pipeline_mode = #tpu.pipeline_mode<synchronous>, transform_indices = @transform_0, window_bounds = array<i64: 8, 128>}, {pipeline_mode = #tpu.pipeline_mode<synchronous>, transform_indices = @transform_1, window_bounds = array<i64: 8, 128>}]} {
    %c0 = arith.constant 0 : index
    %c0_0 = arith.constant 0 : index
    %0 = vector.load %arg1[%c0, %c0_0] : memref<8x128xf32, #tpu.memory_space<vmem>>, vector<8x128xf32>
    %c0_1 = arith.constant 0 : index
    %c0_2 = arith.constant 0 : index
    %1 = vector.load %arg2[%c0_1, %c0_2] : memref<8x128xf32, #tpu.memory_space<vmem>>, vector<8x128xf32>
    tpu.vector_store %arg2[%c0_1, %c0_2], %0 {strides = array<i32>} : memref<8x128xf32, #tpu.memory_space<vmem>>, vector<8x128xf32>,
    return
  }
  func.func @transform_0(%arg0: i32) -> (i32, i32) {
    %c0_i32 = arith.constant 0 : i32
    %c0_i32_0 = arith.constant 0 : i32
    %c0_i32_1 = arith.constant 0 : i32
    return %c0_i32, %c0_i32_0 : i32, i32
  }
  func.func @transform_1(%arg0: i32) -> (i32, i32) {
    %c0_i32 = arith.constant 0 : i32
    %c0_i32_0 = arith.constant 0 : i32
    %c0_i32_1 = arith.constant 0 : i32
    return %c0_i32, %c0_i32_0 : i32, i32
  }
}

module attributes {stable_mosaic.version = 11 : i64} {
  func.func @_patch_embed_kernel(%arg0: i32, %arg1: memref<1x32x48xbf16, #tpu.memory_space<vmem>>, %arg2: memref<48x32xbf16, #tpu.memory_space<vmem>>, %arg3: memref<1x32x32xf32, #tpu.memory_space<vmem>>, %arg4: memref<1x32x32xbf16, #tpu.memory_space<vmem>>) attributes {dimension_semantics = [#tpu.dimension_semantics<parallel>], iteration_bounds = array<i64: 2>, scalar_prefetch = 0 : i64, scratch_operands = 0 : i64, tpu.core_type = #tpu.core_type<tc>, window_params = [{transform_indices = @transform_0, window_bounds = array<i64: 1, 32, 48>}, {pipeline_mode = #tpu.pipeline_mode<synchronous>, transform_indices = @transform_1, window_bounds = array<i64: 48, 32>}, {pipeline_mode = #tpu.pipeline_mode<synchronous>, transform_indices = @transform_2, window_bounds = array<i64: 1, 32, 32>}, {transform_indices = @transform_3, window_bounds = array<i64: 1, 32, 32>}]} {
    %c0 = arith.constant 0 : index
    %c0_0 = arith.constant 0 : index
    %c0_1 = arith.constant 0 : index
    %0 = vector.load %arg1[%c0, %c0_0, %c0_1] : memref<1x32x48xbf16, #tpu.memory_space<vmem>>, vector<1x32x48xbf16>
    %1 = vector.shape_cast %0 : vector<1x32x48xbf16> to vector<32x48xbf16>
    %c0_2 = arith.constant 0 : index
    %c0_3 = arith.constant 0 : index
    %2 = vector.load %arg2[%c0_2, %c0_3] : memref<48x32xbf16, #tpu.memory_space<vmem>>, vector<48x32xbf16>
    %cst = arith.constant dense<0.000000e+00> : vector<32x32xf32>
    %3 = tpu.matmul %1, %2, %cst {dimension_numbers = #tpu.dot_dimension_numbers<[1], [0], [0], [1], [0, 0, 1, 1], [], []>} : vector<32x48xbf16>, vector<48x32xbf16>, vector<32x32xf32> -> vector<32x32xf32>
    %4 = vector.shape_cast %3 : vector<32x32xf32> to vector<1x32x32xf32>
    %c0_4 = arith.constant 0 : index
    %c0_5 = arith.constant 0 : index
    %c0_6 = arith.constant 0 : index
    %5 = vector.load %arg3[%c0_4, %c0_5, %c0_6] : memref<1x32x32xf32, #tpu.memory_space<vmem>>, vector<1x32x32xf32>
    %6 = arith.addf %4, %5 : vector<1x32x32xf32>
    %7 = arith.truncf %6 : vector<1x32x32xf32> to vector<1x32x32xbf16>
    %c0_7 = arith.constant 0 : index
    %c0_8 = arith.constant 0 : index
    %c0_9 = arith.constant 0 : index
    %8 = vector.load %arg4[%c0_7, %c0_8, %c0_9] : memref<1x32x32xbf16, #tpu.memory_space<vmem>>, vector<1x32x32xbf16>
    tpu.vector_store %arg4[%c0_7, %c0_8, %c0_9], %7 {strides = array<i32>} : memref<1x32x32xbf16, #tpu.memory_space<vmem>>, vector<1x32x32xbf16>,
    return
  }
  func.func @transform_0(%arg0: i32) -> (i32, i32, i32) {
    %c0_i32 = arith.constant 0 : i32
    %c0_i32_0 = arith.constant 0 : i32
    %c0_i32_1 = arith.constant 0 : i32
    return %arg0, %c0_i32, %c0_i32_0 : i32, i32, i32
  }
  func.func @transform_1(%arg0: i32) -> (i32, i32) {
    %c0_i32 = arith.constant 0 : i32
    %c0_i32_0 = arith.constant 0 : i32
    %c0_i32_1 = arith.constant 0 : i32
    return %c0_i32, %c0_i32_0 : i32, i32
  }
  func.func @transform_2(%arg0: i32) -> (i32, i32, i32) {
    %c0_i32 = arith.constant 0 : i32
    %c0_i32_0 = arith.constant 0 : i32
    %c0_i32_1 = arith.constant 0 : i32
    %c0_i32_2 = arith.constant 0 : i32
    return %c0_i32, %c0_i32_0, %c0_i32_1 : i32, i32, i32
  }
  func.func @transform_3(%arg0: i32) -> (i32, i32, i32) {
    %c0_i32 = arith.constant 0 : i32
    %c0_i32_0 = arith.constant 0 : i32
    %c0_i32_1 = arith.constant 0 : i32
    return %arg0, %c0_i32, %c0_i32_0 : i32, i32, i32
  }
}

module attributes {stable_mosaic.version = 11 : i64} {
  func.func @_encoder_block_kernel(%arg0: i32, %arg1: memref<1x32x32xbf16, #tpu.memory_space<vmem>>, %arg2: memref<1x32xf32, #tpu.memory_space<vmem>>, %arg3: memref<1x32xf32, #tpu.memory_space<vmem>>, %arg4: memref<32x96xbf16, #tpu.memory_space<vmem>>, %arg5: memref<1x96xf32, #tpu.memory_space<vmem>>, %arg6: memref<32x32xbf16, #tpu.memory_space<vmem>>, %arg7: memref<1x32xf32, #tpu.memory_space<vmem>>, %arg8: memref<1x32xf32, #tpu.memory_space<vmem>>, %arg9: memref<1x32xf32, #tpu.memory_space<vmem>>, %arg10: memref<32x64xbf16, #tpu.memory_space<vmem>>, %arg11: memref<1x64xf32, #tpu.memory_space<vmem>>, %arg12: memref<64x32xbf16, #tpu.memory_space<vmem>>, %arg13: memref<1x32xf32, #tpu.memory_space<vmem>>, %arg14: memref<1x32x32xbf16, #tpu.memory_space<vmem>>) attributes {dimension_semantics = [#tpu.dimension_semantics<parallel>], iteration_bounds = array<i64: 2>, scalar_prefetch = 0 : i64, scratch_operands = 0 : i64, tpu.core_type = #tpu.core_type<tc>, window_params = [{transform_indices = @transform_0, window_bounds = array<i64: 1, 32, 32>}, {pipeline_mode = #tpu.pipeline_mode<synchronous>, transform_indices = @transform_1, window_bounds = array<i64: 1, 32>}, {pipeline_mode = #tpu.pipeline_mode<synchronous>, transform_indices = @transform_2, window_bounds = array<i64: 1, 32>}, {pipeline_mode = #tpu.pipeline_mode<synchronous>, transform_indices = @transform_3, window_bounds = array<i64: 32, 96>}, {pipeline_mode = #tpu.pipeline_mode<synchronous>, transform_indices = @transform_4, window_bounds = array<i64: 1, 96>}, {pipeline_mode = #tpu.pipeline_mode<synchronous>, transform_indices = @transform_5, window_bounds = array<i64: 32, 32>}, {pipeline_mode = #tpu.pipeline_mode<synchronous>, transform_indices = @transform_6, window_bounds = array<i64: 1, 32>}, {pipeline_mode = #tpu.pipeline_mode<synchronous>, transform_indices = @transform_7, window_bounds = array<i64: 1, 32>}, {pipeline_mode = #tpu.pipeline_mode<synchronous>, transform_indices = @transform_8, window_bounds = array<i64: 1, 32>}, {pipeline_mode = #tpu.pipeline_mode<synchronous>, transform_indices = @transform_9, window_bounds = array<i64: 32, 64>}, {pipeline_mode = #tpu.pipeline_mode<synchronous>, transform_indices = @transform_10, window_bounds = array<i64: 1, 64>}, {pipeline_mode = #tpu.pipeline_mode<synchronous>, transform_indices = @transform_11, window_bounds = array<i64: 64, 32>}, {pipeline_mode = #tpu.pipeline_mode<synchronous>, transform_indices = @transform_12, window_bounds = array<i64: 1, 32>}, {transform_indices = @transform_13, window_bounds = array<i64: 1, 32, 32>}]} {
    %c0 = arith.constant 0 : index
    %c0_0 = arith.constant 0 : index
    %c0_1 = arith.constant 0 : index
    %0 = vector.load %arg1[%c0, %c0_0, %c0_1] : memref<1x32x32xbf16, #tpu.memory_space<vmem>>, vector<1x32x32xbf16>
    %1 = arith.extf %0 : vector<1x32x32xbf16> to vector<1x32x32xf32>
    %2 = vector.shape_cast %1 : vector<1x32x32xf32> to vector<32x32xf32>
    %c0_2 = arith.constant 0 : index
    %c0_3 = arith.constant 0 : index
    %3 = vector.load %arg2[%c0_2, %c0_3] : memref<1x32xf32, #tpu.memory_space<vmem>>, vector<1x32xf32>
    %c0_4 = arith.constant 0 : index
    %c0_5 = arith.constant 0 : index
    %4 = vector.load %arg3[%c0_4, %c0_5] : memref<1x32xf32, #tpu.memory_space<vmem>>, vector<1x32xf32>
    %cst = arith.constant dense<0.000000e+00> : vector<32xf32>
    %5 = vector.multi_reduction <add>, %2, %cst [1] : vector<32x32xf32> to vector<32xf32>
    %6 = vector.shape_cast %5 : vector<32xf32> to vector<32x1xf32>
    %cst_6 = arith.constant 3.200000e+01 : f32
    %7 = vector.broadcast %cst_6 : f32 to vector<32x1xf32>
    %8 = arith.divf %6, %7 : vector<32x1xf32>
    %9 = vector.broadcast %8 : vector<32x1xf32> to vector<32x32xf32>
    %10 = arith.subf %2, %9 : vector<32x32xf32>
    %11 = arith.mulf %10, %10 : vector<32x32xf32>
    %cst_7 = arith.constant dense<0.000000e+00> : vector<32xf32>
    %12 = vector.multi_reduction <add>, %11, %cst_7 [1] : vector<32x32xf32> to vector<32xf32>
    %13 = vector.shape_cast %12 : vector<32xf32> to vector<32x1xf32>
    %cst_8 = arith.constant 3.200000e+01 : f32
    %14 = vector.broadcast %cst_8 : f32 to vector<32x1xf32>
    %15 = arith.divf %13, %14 : vector<32x1xf32>
    %cst_9 = arith.constant 9.99999974E-6 : f32
    %16 = vector.broadcast %cst_9 : f32 to vector<32x1xf32>
    %17 = arith.addf %15, %16 : vector<32x1xf32>
    %18 = math.rsqrt %17 : vector<32x1xf32>
    %19 = vector.broadcast %18 : vector<32x1xf32> to vector<32x32xf32>
    %20 = arith.mulf %10, %19 : vector<32x32xf32>
    %21 = vector.broadcast %3 : vector<1x32xf32> to vector<32x32xf32>
    %22 = arith.mulf %20, %21 : vector<32x32xf32>
    %23 = vector.broadcast %4 : vector<1x32xf32> to vector<32x32xf32>
    %24 = arith.addf %22, %23 : vector<32x32xf32>
    %25 = arith.truncf %24 : vector<32x32xf32> to vector<32x32xbf16>
    %c0_10 = arith.constant 0 : index
    %c0_11 = arith.constant 0 : index
    %26 = vector.load %arg4[%c0_10, %c0_11] : memref<32x96xbf16, #tpu.memory_space<vmem>>, vector<32x96xbf16>
    %cst_12 = arith.constant dense<0.000000e+00> : vector<32x96xf32>
    %27 = tpu.matmul %25, %26, %cst_12 {dimension_numbers = #tpu.dot_dimension_numbers<[1], [0], [0], [1], [0, 0, 1, 1], [], []>} : vector<32x32xbf16>, vector<32x96xbf16>, vector<32x96xf32> -> vector<32x96xf32>
    %c0_13 = arith.constant 0 : index
    %c0_14 = arith.constant 0 : index
    %28 = vector.load %arg5[%c0_13, %c0_14] : memref<1x96xf32, #tpu.memory_space<vmem>>, vector<1x96xf32>
    %29 = vector.broadcast %28 : vector<1x96xf32> to vector<32x96xf32>
    %30 = arith.addf %27, %29 : vector<32x96xf32>
    %31 = vector.extract_strided_slice %30 {offsets = [0, 0], sizes = [32, 8], strides = [1, 1]} : vector<32x96xf32> to vector<32x8xf32>
    %32 = vector.shape_cast %31 : vector<32x8xf32> to vector<1x32x8xf32>
    %33 = vector.extract_strided_slice %30 {offsets = [0, 8], sizes = [32, 8], strides = [1, 1]} : vector<32x96xf32> to vector<32x8xf32>
    %34 = vector.shape_cast %33 : vector<32x8xf32> to vector<1x32x8xf32>
    %35 = vector.extract_strided_slice %30 {offsets = [0, 16], sizes = [32, 8], strides = [1, 1]} : vector<32x96xf32> to vector<32x8xf32>
    %36 = vector.shape_cast %35 : vector<32x8xf32> to vector<1x32x8xf32>
    %37 = vector.extract_strided_slice %30 {offsets = [0, 24], sizes = [32, 8], strides = [1, 1]} : vector<32x96xf32> to vector<32x8xf32>
    %38 = vector.shape_cast %37 : vector<32x8xf32> to vector<1x32x8xf32>
    %39 = tpu.concatenate %32, %34, %36, %38 in 0 : vector<1x32x8xf32>, vector<1x32x8xf32>, vector<1x32x8xf32>, vector<1x32x8xf32> -> vector<4x32x8xf32>
    %40 = arith.truncf %39 : vector<4x32x8xf32> to vector<4x32x8xbf16>
    %41 = vector.extract_strided_slice %30 {offsets = [0, 32], sizes = [32, 8], strides = [1, 1]} : vector<32x96xf32> to vector<32x8xf32>
    %42 = vector.shape_cast %41 : vector<32x8xf32> to vector<1x32x8xf32>
    %43 = vector.extract_strided_slice %30 {offsets = [0, 40], sizes = [32, 8], strides = [1, 1]} : vector<32x96xf32> to vector<32x8xf32>
    %44 = vector.shape_cast %43 : vector<32x8xf32> to vector<1x32x8xf32>
    %45 = vector.extract_strided_slice %30 {offsets = [0, 48], sizes = [32, 8], strides = [1, 1]} : vector<32x96xf32> to vector<32x8xf32>
    %46 = vector.shape_cast %45 : vector<32x8xf32> to vector<1x32x8xf32>
    %47 = vector.extract_strided_slice %30 {offsets = [0, 56], sizes = [32, 8], strides = [1, 1]} : vector<32x96xf32> to vector<32x8xf32>
    %48 = vector.shape_cast %47 : vector<32x8xf32> to vector<1x32x8xf32>
    %49 = tpu.concatenate %42, %44, %46, %48 in 0 : vector<1x32x8xf32>, vector<1x32x8xf32>, vector<1x32x8xf32>, vector<1x32x8xf32> -> vector<4x32x8xf32>
    %50 = arith.truncf %49 : vector<4x32x8xf32> to vector<4x32x8xbf16>
    %51 = vector.extract_strided_slice %30 {offsets = [0, 64], sizes = [32, 8], strides = [1, 1]} : vector<32x96xf32> to vector<32x8xf32>
    %52 = vector.shape_cast %51 : vector<32x8xf32> to vector<1x32x8xf32>
    %53 = vector.extract_strided_slice %30 {offsets = [0, 72], sizes = [32, 8], strides = [1, 1]} : vector<32x96xf32> to vector<32x8xf32>
    %54 = vector.shape_cast %53 : vector<32x8xf32> to vector<1x32x8xf32>
    %55 = vector.extract_strided_slice %30 {offsets = [0, 80], sizes = [32, 8], strides = [1, 1]} : vector<32x96xf32> to vector<32x8xf32>
    %56 = vector.shape_cast %55 : vector<32x8xf32> to vector<1x32x8xf32>
    %57 = vector.extract_strided_slice %30 {offsets = [0, 88], sizes = [32, 8], strides = [1, 1]} : vector<32x96xf32> to vector<32x8xf32>
    %58 = vector.shape_cast %57 : vector<32x8xf32> to vector<1x32x8xf32>
    %59 = tpu.concatenate %52, %54, %56, %58 in 0 : vector<1x32x8xf32>, vector<1x32x8xf32>, vector<1x32x8xf32>, vector<1x32x8xf32> -> vector<4x32x8xf32>
    %60 = arith.truncf %59 : vector<4x32x8xf32> to vector<4x32x8xbf16>
    "tpu.trace_start"() <{level = 10 : i32, message = "gnd,gmd->gnm"}> : () -> ()
    %cst_15 = arith.constant dense<0.000000e+00> : vector<4x32x32xf32>
    %61 = tpu.matmul %40, %50, %cst_15 {dimension_numbers = #tpu.dot_dimension_numbers<[2], [2], [1], [1], [0, 0, 0, 1, 1, 1], [0], [0]>} : vector<4x32x8xbf16>, vector<4x32x8xbf16>, vector<4x32x32xf32> -> vector<4x32x32xf32>
    "tpu.trace_stop"() : () -> ()
    %62 = tpu.iota {dimensions = array<i32: 2>} : vector<1x1x32xi32>
    %c17_i32 = arith.constant 17 : i32
    %63 = vector.broadcast %c17_i32 : i32 to vector<1x1x32xi32>
    %64 = arith.cmpi slt, %62, %63 : vector<1x1x32xi32>
    %cst_16 = arith.constant -1.000000e+30 : f32
    %65 = vector.shape_cast %64 : vector<1x1x32xi1> to vector<1x1x32xi1>
    %66 = vector.broadcast %65 : vector<1x1x32xi1> to vector<4x32x32xi1>
    %67 = vector.broadcast %cst_16 : f32 to vector<4x32x32xf32>
    %68 = arith.select %66, %61, %67 : vector<4x32x32xi1>, vector<4x32x32xf32>
    %cst_17 = arith.constant dense<0xFF800000> : vector<4x32xf32>
    %69 = vector.multi_reduction <maximumf>, %68, %cst_17 [2] : vector<4x32x32xf32> to vector<4x32xf32>
    %70 = vector.shape_cast %69 : vector<4x32xf32> to vector<4x32x1xf32>
    %71 = vector.broadcast %70 : vector<4x32x1xf32> to vector<4x32x32xf32>
    %72 = arith.subf %68, %71 : vector<4x32x32xf32>
    %73 = math.exp %72 : vector<4x32x32xf32>
    %cst_18 = arith.constant dense<0.000000e+00> : vector<4x32xf32>
    %74 = vector.multi_reduction <add>, %73, %cst_18 [2] : vector<4x32x32xf32> to vector<4x32xf32>
    %75 = vector.shape_cast %74 : vector<4x32xf32> to vector<4x32x1xf32>
    %76 = vector.broadcast %75 : vector<4x32x1xf32> to vector<4x32x32xf32>
    %77 = arith.divf %73, %76 : vector<4x32x32xf32>
    %78 = arith.truncf %77 : vector<4x32x32xf32> to vector<4x32x32xbf16>
    "tpu.trace_start"() <{level = 10 : i32, message = "gnm,gmd->gnd"}> : () -> ()
    %cst_19 = arith.constant dense<0.000000e+00> : vector<4x32x8xf32>
    %79 = tpu.matmul %78, %60, %cst_19 {dimension_numbers = #tpu.dot_dimension_numbers<[2], [1], [1], [2], [0, 0, 0, 1, 1, 2], [0], [0]>} : vector<4x32x32xbf16>, vector<4x32x8xbf16>, vector<4x32x8xf32> -> vector<4x32x8xf32>
    "tpu.trace_stop"() : () -> ()
    %80 = vector.extract_strided_slice %79 {offsets = [0, 0, 0], sizes = [1, 32, 8], strides = [1, 1, 1]} : vector<4x32x8xf32> to vector<1x32x8xf32>
    %81 = vector.shape_cast %80 : vector<1x32x8xf32> to vector<32x8xf32>
    %82 = vector.extract_strided_slice %79 {offsets = [1, 0, 0], sizes = [1, 32, 8], strides = [1, 1, 1]} : vector<4x32x8xf32> to vector<1x32x8xf32>
    %83 = vector.shape_cast %82 : vector<1x32x8xf32> to vector<32x8xf32>
    %84 = vector.extract_strided_slice %79 {offsets = [2, 0, 0], sizes = [1, 32, 8], strides = [1, 1, 1]} : vector<4x32x8xf32> to vector<1x32x8xf32>
    %85 = vector.shape_cast %84 : vector<1x32x8xf32> to vector<32x8xf32>
    %86 = vector.extract_strided_slice %79 {offsets = [3, 0, 0], sizes = [1, 32, 8], strides = [1, 1, 1]} : vector<4x32x8xf32> to vector<1x32x8xf32>
    %87 = vector.shape_cast %86 : vector<1x32x8xf32> to vector<32x8xf32>
    %88 = tpu.concatenate %81, %83, %85, %87 in 1 : vector<32x8xf32>, vector<32x8xf32>, vector<32x8xf32>, vector<32x8xf32> -> vector<32x32xf32>
    %89 = arith.truncf %88 : vector<32x32xf32> to vector<32x32xbf16>
    %c0_20 = arith.constant 0 : index
    %c0_21 = arith.constant 0 : index
    %90 = vector.load %arg6[%c0_20, %c0_21] : memref<32x32xbf16, #tpu.memory_space<vmem>>, vector<32x32xbf16>
    %cst_22 = arith.constant dense<0.000000e+00> : vector<32x32xf32>
    %91 = tpu.matmul %89, %90, %cst_22 {dimension_numbers = #tpu.dot_dimension_numbers<[1], [0], [0], [1], [0, 0, 1, 1], [], []>} : vector<32x32xbf16>, vector<32x32xbf16>, vector<32x32xf32> -> vector<32x32xf32>
    %c0_23 = arith.constant 0 : index
    %c0_24 = arith.constant 0 : index
    %92 = vector.load %arg7[%c0_23, %c0_24] : memref<1x32xf32, #tpu.memory_space<vmem>>, vector<1x32xf32>
    %93 = vector.broadcast %92 : vector<1x32xf32> to vector<32x32xf32>
    %94 = arith.addf %91, %93 : vector<32x32xf32>
    %95 = arith.addf %2, %94 : vector<32x32xf32>
    %c0_25 = arith.constant 0 : index
    %c0_26 = arith.constant 0 : index
    %96 = vector.load %arg8[%c0_25, %c0_26] : memref<1x32xf32, #tpu.memory_space<vmem>>, vector<1x32xf32>
    %c0_27 = arith.constant 0 : index
    %c0_28 = arith.constant 0 : index
    %97 = vector.load %arg9[%c0_27, %c0_28] : memref<1x32xf32, #tpu.memory_space<vmem>>, vector<1x32xf32>
    %cst_29 = arith.constant dense<0.000000e+00> : vector<32xf32>
    %98 = vector.multi_reduction <add>, %95, %cst_29 [1] : vector<32x32xf32> to vector<32xf32>
    %99 = vector.shape_cast %98 : vector<32xf32> to vector<32x1xf32>
    %cst_30 = arith.constant 3.200000e+01 : f32
    %100 = vector.broadcast %cst_30 : f32 to vector<32x1xf32>
    %101 = arith.divf %99, %100 : vector<32x1xf32>
    %102 = vector.broadcast %101 : vector<32x1xf32> to vector<32x32xf32>
    %103 = arith.subf %95, %102 : vector<32x32xf32>
    %104 = arith.mulf %103, %103 : vector<32x32xf32>
    %cst_31 = arith.constant dense<0.000000e+00> : vector<32xf32>
    %105 = vector.multi_reduction <add>, %104, %cst_31 [1] : vector<32x32xf32> to vector<32xf32>
    %106 = vector.shape_cast %105 : vector<32xf32> to vector<32x1xf32>
    %cst_32 = arith.constant 3.200000e+01 : f32
    %107 = vector.broadcast %cst_32 : f32 to vector<32x1xf32>
    %108 = arith.divf %106, %107 : vector<32x1xf32>
    %cst_33 = arith.constant 9.99999974E-6 : f32
    %109 = vector.broadcast %cst_33 : f32 to vector<32x1xf32>
    %110 = arith.addf %108, %109 : vector<32x1xf32>
    %111 = math.rsqrt %110 : vector<32x1xf32>
    %112 = vector.broadcast %111 : vector<32x1xf32> to vector<32x32xf32>
    %113 = arith.mulf %103, %112 : vector<32x32xf32>
    %114 = vector.broadcast %96 : vector<1x32xf32> to vector<32x32xf32>
    %115 = arith.mulf %113, %114 : vector<32x32xf32>
    %116 = vector.broadcast %97 : vector<1x32xf32> to vector<32x32xf32>
    %117 = arith.addf %115, %116 : vector<32x32xf32>
    %118 = arith.truncf %117 : vector<32x32xf32> to vector<32x32xbf16>
    %c0_34 = arith.constant 0 : index
    %c0_35 = arith.constant 0 : index
    %119 = vector.load %arg10[%c0_34, %c0_35] : memref<32x64xbf16, #tpu.memory_space<vmem>>, vector<32x64xbf16>
    %cst_36 = arith.constant dense<0.000000e+00> : vector<32x64xf32>
    %120 = tpu.matmul %118, %119, %cst_36 {dimension_numbers = #tpu.dot_dimension_numbers<[1], [0], [0], [1], [0, 0, 1, 1], [], []>} : vector<32x32xbf16>, vector<32x64xbf16>, vector<32x64xf32> -> vector<32x64xf32>
    %c0_37 = arith.constant 0 : index
    %c0_38 = arith.constant 0 : index
    %121 = vector.load %arg11[%c0_37, %c0_38] : memref<1x64xf32, #tpu.memory_space<vmem>>, vector<1x64xf32>
    %122 = vector.broadcast %121 : vector<1x64xf32> to vector<32x64xf32>
    %123 = arith.addf %120, %122 : vector<32x64xf32>
    %cst_39 = arith.constant 5.000000e-01 : f32
    %124 = vector.broadcast %cst_39 : f32 to vector<32x64xf32>
    %125 = arith.mulf %124, %123 : vector<32x64xf32>
    %126 = arith.mulf %123, %123 : vector<32x64xf32>
    %127 = arith.mulf %126, %123 : vector<32x64xf32>
    %cst_40 = arith.constant 4.471500e-02 : f32
    %128 = vector.broadcast %cst_40 : f32 to vector<32x64xf32>
    %129 = arith.mulf %128, %127 : vector<32x64xf32>
    %130 = arith.addf %123, %129 : vector<32x64xf32>
    %cst_41 = arith.constant 0.797884583 : f32
    %131 = vector.broadcast %cst_41 : f32 to vector<32x64xf32>
    %132 = arith.mulf %131, %130 : vector<32x64xf32>
    %133 = math.tanh %132 : vector<32x64xf32>
    %cst_42 = arith.constant 1.000000e+00 : f32
    %134 = vector.broadcast %cst_42 : f32 to vector<32x64xf32>
    %135 = arith.addf %134, %133 : vector<32x64xf32>
    %136 = arith.mulf %125, %135 : vector<32x64xf32>
    %137 = arith.truncf %136 : vector<32x64xf32> to vector<32x64xbf16>
    %c0_43 = arith.constant 0 : index
    %c0_44 = arith.constant 0 : index
    %138 = vector.load %arg12[%c0_43, %c0_44] : memref<64x32xbf16, #tpu.memory_space<vmem>>, vector<64x32xbf16>
    %cst_45 = arith.constant dense<0.000000e+00> : vector<32x32xf32>
    %139 = tpu.matmul %137, %138, %cst_45 {dimension_numbers = #tpu.dot_dimension_numbers<[1], [0], [0], [1], [0, 0, 1, 1], [], []>} : vector<32x64xbf16>, vector<64x32xbf16>, vector<32x32xf32> -> vector<32x32xf32>
    %c0_46 = arith.constant 0 : index
    %c0_47 = arith.constant 0 : index
    %140 = vector.load %arg13[%c0_46, %c0_47] : memref<1x32xf32, #tpu.memory_space<vmem>>, vector<1x32xf32>
    %141 = vector.broadcast %140 : vector<1x32xf32> to vector<32x32xf32>
    %142 = arith.addf %139, %141 : vector<32x32xf32>
    %143 = arith.addf %95, %142 : vector<32x32xf32>
    %144 = vector.shape_cast %143 : vector<32x32xf32> to vector<1x32x32xf32>
    %145 = arith.truncf %144 : vector<1x32x32xf32> to vector<1x32x32xbf16>
    %c0_48 = arith.constant 0 : index
    %c0_49 = arith.constant 0 : index
    %c0_50 = arith.constant 0 : index
    %146 = vector.load %arg14[%c0_48, %c0_49, %c0_50] : memref<1x32x32xbf16, #tpu.memory_space<vmem>>, vector<1x32x32xbf16>
    tpu.vector_store %arg14[%c0_48, %c0_49, %c0_50], %145 {strides = array<i32>} : memref<1x32x32xbf16, #tpu.memory_space<vmem>>, vector<1x32x32xbf16>,
    return
  }
  func.func @transform_0(%arg0: i32) -> (i32, i32, i32) {
    %c0_i32 = arith.constant 0 : i32
    %c0_i32_0 = arith.constant 0 : i32
    %c0_i32_1 = arith.constant 0 : i32
    return %arg0, %c0_i32, %c0_i32_0 : i32, i32, i32
  }
  func.func @transform_1(%arg0: i32) -> (i32, i32) {
    %c0_i32 = arith.constant 0 : i32
    %c0_i32_0 = arith.constant 0 : i32
    %c0_i32_1 = arith.constant 0 : i32
    return %c0_i32, %c0_i32_0 : i32, i32
  }
  func.func @transform_2(%arg0: i32) -> (i32, i32) {
    %c0_i32 = arith.constant 0 : i32
    %c0_i32_0 = arith.constant 0 : i32
    %c0_i32_1 = arith.constant 0 : i32
    return %c0_i32, %c0_i32_0 : i32, i32
  }
  func.func @transform_3(%arg0: i32) -> (i32, i32) {
    %c0_i32 = arith.constant 0 : i32
    %c0_i32_0 = arith.constant 0 : i32
    %c0_i32_1 = arith.constant 0 : i32
    return %c0_i32, %c0_i32_0 : i32, i32
  }
  func.func @transform_4(%arg0: i32) -> (i32, i32) {
    %c0_i32 = arith.constant 0 : i32
    %c0_i32_0 = arith.constant 0 : i32
    %c0_i32_1 = arith.constant 0 : i32
    return %c0_i32, %c0_i32_0 : i32, i32
  }
  func.func @transform_5(%arg0: i32) -> (i32, i32) {
    %c0_i32 = arith.constant 0 : i32
    %c0_i32_0 = arith.constant 0 : i32
    %c0_i32_1 = arith.constant 0 : i32
    return %c0_i32, %c0_i32_0 : i32, i32
  }
  func.func @transform_6(%arg0: i32) -> (i32, i32) {
    %c0_i32 = arith.constant 0 : i32
    %c0_i32_0 = arith.constant 0 : i32
    %c0_i32_1 = arith.constant 0 : i32
    return %c0_i32, %c0_i32_0 : i32, i32
  }
  func.func @transform_7(%arg0: i32) -> (i32, i32) {
    %c0_i32 = arith.constant 0 : i32
    %c0_i32_0 = arith.constant 0 : i32
    %c0_i32_1 = arith.constant 0 : i32
    return %c0_i32, %c0_i32_0 : i32, i32
  }
  func.func @transform_8(%arg0: i32) -> (i32, i32) {
    %c0_i32 = arith.constant 0 : i32
    %c0_i32_0 = arith.constant 0 : i32
    %c0_i32_1 = arith.constant 0 : i32
    return %c0_i32, %c0_i32_0 : i32, i32
  }
  func.func @transform_9(%arg0: i32) -> (i32, i32) {
    %c0_i32 = arith.constant 0 : i32
    %c0_i32_0 = arith.constant 0 : i32
    %c0_i32_1 = arith.constant 0 : i32
    return %c0_i32, %c0_i32_0 : i32, i32
  }
  func.func @transform_10(%arg0: i32) -> (i32, i32) {
    %c0_i32 = arith.constant 0 : i32
    %c0_i32_0 = arith.constant 0 : i32
    %c0_i32_1 = arith.constant 0 : i32
    return %c0_i32, %c0_i32_0 : i32, i32
  }
  func.func @transform_11(%arg0: i32) -> (i32, i32) {
    %c0_i32 = arith.constant 0 : i32
    %c0_i32_0 = arith.constant 0 : i32
    %c0_i32_1 = arith.constant 0 : i32
    return %c0_i32, %c0_i32_0 : i32, i32
  }
  func.func @transform_12(%arg0: i32) -> (i32, i32) {
    %c0_i32 = arith.constant 0 : i32
    %c0_i32_0 = arith.constant 0 : i32
    %c0_i32_1 = arith.constant 0 : i32
    return %c0_i32, %c0_i32_0 : i32, i32
  }
  func.func @transform_13(%arg0: i32) -> (i32, i32, i32) {
    %c0_i32 = arith.constant 0 : i32
    %c0_i32_0 = arith.constant 0 : i32
    %c0_i32_1 = arith.constant 0 : i32
    return %arg0, %c0_i32, %c0_i32_0 : i32, i32, i32
  }
}

</mosaic_0001>

<bundles_post_ra>
// kernel: tpu_custom_call.1
= control target key start
LH: loop header
LB: loop body
LE: loop exit
PB: predicated region body
PF: predicated region fallthrough
CT: control target
= control target key end

     0   :  { %6 = vsyncpa [#allocation3], 0  ;;  %s286_s0 = inlined_call_operand.hbm [shape: f32[8,128], index: 0, kind: input, shape index: {}]   ;;  %s287_s1 = inlined_call_operand.hbm [shape: f32[8,128], index: 1, kind: output, shape index: {}]  }
   0x1   :  { %7 = vsyncpa [#allocation4], 0  ;;  %s269_s6 = smov 0  }
   0x2 LB: > { %s148_s7 = sadd.s32 4294967295, %s255_s6   ;;  %p149_p0 = scmp.ge.s32.totalorder %s255_s6, 1  ;;  %s255_s6 = sphi %s269_s6, %s13_s6  }
   0x3   : > { %p60_p1 = scmp.lt.s32.totalorder %s255_s6, 3  ;;  %s72_s10 = sshll.u32 %s286_s0, 4  ;;  %s73_s10 = int_to_ptr.hbm [resolvable:$true] %s72_s10 }
   0x4   : > { %p169_p3 = scmp.eq.s32.totalorder %s148_s7, 0  ;;  %s257_s11 = smov [#allocation2]  }
   0x5   : > { %p61_p2 = pnand %p149_p0, %p60_p1  ;;  %s74_s12 = sshll.u32 %s257_s11, 4  ;;  %s75_s12 = int_to_ptr.vmem [resolvable:$true] %s74_s12 }
   0x7   : > { %p165_p4 = pneg %p61_p2  ;;  %87 = sbr.rel (%p61_p2) target bundleno = 19 (0x13), region = 24 }
   0x9   : > { %p166_p5 = pnand %p169_p3, %p165_p4 }
   0xb   : > { %168 = dma.hbm_to_vmem [thread:$0]  (!%p166_p5), %s73_s10, 128, %s75_s12, [#allocation3]  }
   0xc   : > { %246 = dma.done.wait (%p169_p3), [#allocation3], 128  }
   0xd   : > { %248 = vsyncadd (%p169_p3), [#allocation3], 4294967168  ;;  %s258_s13 = smov [#allocation5]   ;;  %s108_s17 = sshll.u32 %s287_s1, 4  ;;  %v98_v0 = vld [vmem:[#allocation2] sm:$0xff]  ;;  %s109_s17 = int_to_ptr.hbm [resolvable:$true] %s108_s17 }
   0xe   : > { %s106_s14 = sshll.u32 %s258_s13, 4  ;;  %p171_p6 = scmp.eq.s32.totalorder %s148_s7, 1  ;;  %99 = vst [vmem:[#allocation5] sm:$0xff] %v98_v0  ;;  %s107_s14 = int_to_ptr.vmem [resolvable:$true] %s106_s14 }
  0x10   : > { %162 = dma.vmem_to_hbm [thread:$0]  (%p171_p6), %s107_s14, 128, %s109_s17, [#allocation4]  }
  0x11   : > { %250 = dma.done.wait (%p171_p6), [#allocation4], 128  }
  0x12   : > { %252 = vsyncadd (%p171_p6), [#allocation4], 4294967168 }
  0x13 PF: > { %s13_s6 = sadd.s32 1, %s255_s6  }
  0x14   : > { %p10_p7 = scmp.ge.s32.totalorder %s13_s6, 4  }
  0x16   :  { %12 = sbr.rel (!%p10_p7) target bundleno = 2 (0x2), region = 53 }
  0x1b   :  { %122 = vsyncpa [#allocation3], 1 }
  0x1c   :  { %124 = vsyncpa [#allocation3 + $0x1], 1 }
  0x1d   :  { %125 = vsyncpa [#allocation4], 1 }
  0x1e   :  { %127 = vsyncpa [#allocation4 + $0x1], 1 }

// kernel: vit_forward_pallas.3
= control target key start
LH: loop header
LB: loop body
LE: loop exit
PB: predicated region body
PF: predicated region fallthrough
CT: control target
= control target key end

     0   :  { %s387_s12 = smov 0   ;;  %s425_s0 = inlined_call_operand.vmem [shape: bf16[2,32,48], index: 0, kind: input, shape index: {}]   ;;  %s426_s1 = inlined_call_operand.vmem [shape: bf16[48,32], index: 1, kind: input, shape index: {}]   ;;  %s427_s2 = inlined_call_operand.vmem [shape: f32[1,32,32], index: 2, kind: input, shape index: {}]   ;;  %s428_s3 = inlined_call_operand.vmem [shape: bf16[2,32,32], index: 3, kind: output, shape index: {}]  }
   0x1 LB: > { %s308_s13 = sadd.s32 4294967295, %s365_s12   ;;  %p312_p0 = scmp.ge.s32.totalorder %s365_s12, 1  ;;  %s365_s12 = sphi %s387_s12, %s13_s12  }
   0x2   : > { %p137_p1 = scmp.lt.s32.totalorder %s365_s12, 3 }
   0x4   : > { %p138_p2 = pnand %p312_p0, %p137_p1 }
   0x5   : > { %p161_p3 = scmp.lt.s32.totalorder (!%p138_p2), %s308_s13, 1 }
   0x6   : > { %141 = sbr.rel (%p138_p2) target bundleno = 163 (0xa3), region = 32 }
   0xb   : > { %v347_v0 = vld [vmem:[%s426_s1 + $0x10] sm:$0xff]  ;;  %v346_v1 = vld [vmem:[%s426_s1 + $0x8] sm:$0xff]  ;;  %s430_s13 = smov (!%p161_p3, %s308_s13), 1  ;;  %v345_v2 = vld [vmem:[%s426_s1] sm:$0xff]  ;;  %vm210_vm0 = vcmask 392192   ;;  %vm248_vm1 = vcmask 257024  }
   0xc   : > { %222 = vmatpush.bf16.msra.mxu0 %v347_v0  ;;  %348 = vmatpush.bf16.msra.mxu1 %v347_v0  ;;  %s341_s18 = sshll.u32 %s430_s13, 4  ;;  %v236_v5 = vld [vmem:[%s427_s2] sm:$0xff]  ;;  %v238_v6 = vld [vmem:[%s427_s2 + $0x10] sm:$0xff]  ;;  %v237_v13 = vld [vmem:[%s427_s2 + $0x8] sm:$0xff] }
   0xd   : > { %s165_s23 = scalar_lea.vmem %s425_s0, %s341_s18  ;;  %s170_s30 = scalar_lea.vmem %s428_s3, %s341_s18  ;;  %v239_v14 = vld [vmem:[%s427_s2 + $0x18] sm:$0xff] }
   0xe   : > { %v343_v3 = vld [vmem:[%s165_s23] sm:$0xff]  ;;  %v344_v4 = vld [vmem:[%s165_s23 + $0x8] sm:$0xff] }
  0x10   : > { %223 = vmatpush.bf16.msra.mxu0 %v346_v1  ;;  %349 = vmatpush.bf16.msra.mxu1 %v346_v1 }
  0x14   : > { %224 = vmatpush.bf16.msra.mxu0 %v345_v2  ;;  %350 = vmatpush.bf16.msra.mxu1 %v345_v2 }
  0x17   : > { %337 = vmatmul.msk.bf16.vlgmr.msra.gmra.mxu0 %vm210_vm0, %v343_v3  ;;  %338 = vmatmul.msk.bf16.vlgmr.msra.gmra.mxu1 %vm210_vm0, %v344_v4 }
  0x94   : > { %v226_v7 = vpop.f32.mrf.mxu0  ;;  %v231_v8 = vpop.f32.mrf.mxu1 }
  0x95   : > { %v240_v9 = vadd.f32 %v236_v5, %v226_v7  ;;  %v242_v10 = vadd.f32 %v238_v6, %v231_v8 }
  0x97   : > { %v244_v11 = vpack.c.bf16 %v240_v9, %v240_v9  ;;  %v246_v12 = vpack.c.bf16 %v242_v10, %v242_v10 }
  0x99   : > { %249 = vst.msk [vmem:[%s170_s30] sm:$0xf] %vm248_vm1, %v244_v11 }
  0x9a   : > { %251 = vst.msk [vmem:[%s170_s30 + $0x8] sm:$0xf] %vm248_vm1, %v246_v12 }
  0x9c   : > { %v228_v15 = vpop.f32.mrf.mxu0  ;;  %v233_v16 = vpop.f32.mrf.mxu1 }
  0x9d   : > { %v241_v17 = vadd.f32 %v237_v13, %v228_v15  ;;  %v243_v18 = vadd.f32 %v239_v14, %v233_v16 }
  0x9f   : > { %v245_v19 = vpack.c.bf16 %v241_v17, %v241_v17  ;;  %v247_v20 = vpack.c.bf16 %v243_v18, %v243_v18 }
  0xa1   : > { %250 = vst.msk [vmem:[%s170_s30 + $0x4] sm:$0xf] %vm248_vm1, %v245_v19 }
  0xa2   : > { %252 = vst.msk [vmem:[%s170_s30 + $0xc] sm:$0xf] %vm248_vm1, %v247_v20 }
  0xa3 PF: > { %s13_s12 = sadd.s32 1, %s365_s12  }
  0xa4   : > { %p10_p4 = scmp.ge.s32.totalorder %s13_s12, 4  }
  0xa6   :  { %12 = sbr.rel (!%p10_p4) target bundleno = 1 (0x1), region = 62 }

// kernel: vit_forward_pallas.4
= control target key start
LH: loop header
LB: loop body
LE: loop exit
PB: predicated region body
PF: predicated region fallthrough
CT: control target
= control target key end

     0   :  { %s2221_s25 = smov 0   ;;  %s3030_s0 = inlined_call_operand.vmem [shape: bf16[2,32,32], index: 0, kind: input, shape index: {}]   ;;  %s3031_s1 = inlined_call_operand.vmem [shape: f32[1,32], index: 1, kind: input, shape index: {}]   ;;  %s3032_s2 = inlined_call_operand.vmem [shape: f32[1,32], index: 2, kind: input, shape index: {}]   ;;  %s3033_s3 = inlined_call_operand.vmem [shape: bf16[32,96], index: 3, kind: input, shape index: {}]   ;;  %s3034_s4 = inlined_call_operand.vmem [shape: f32[1,96], index: 4, kind: input, shape index: {}]   ;;  %s3035_s5 = inlined_call_operand.vmem [shape: bf16[32,32], index: 5, kind: input, shape index: {}]   ;;  %s3036_s6 = inlined_call_operand.vmem [shape: f32[1,32], index: 6, kind: input, shape index: {}]   ;;  %s3037_s7 = inlined_call_operand.vmem [shape: f32[1,32], index: 7, kind: input, shape index: {}]   ;;  %s3038_s8 = inlined_call_operand.vmem [shape: f32[1,32], index: 8, kind: input, shape index: {}]   ;;  %s3039_s9 = inlined_call_operand.vmem [shape: bf16[32,64], index: 9, kind: input, shape index: {}]   ;;  %s3040_s10 = inlined_call_operand.vmem [shape: f32[1,64], index: 10, kind: input, shape index: {}]   ;;  %s3041_s11 = inlined_call_operand.vmem [shape: bf16[64,32], index: 11, kind: input, shape index: {}]   ;;  %s3042_s12 = inlined_call_operand.vmem [shape: f32[1,32], index: 12, kind: input, shape index: {}]   ;;  %s3043_s13 = inlined_call_operand.vmem [shape: bf16[2,32,32], index: 13, kind: output, shape index: {}]  }
   0x1 LB: > { %s1863_s26 = sadd.s32 4294967295, %s2140_s25   ;;  %p1867_p0 = scmp.ge.s32.totalorder %s2140_s25, 1  ;;  %s2140_s25 = sphi %s2221_s25, %s23_s25  }
   0x2   : > { %p387_p1 = scmp.lt.s32.totalorder %s2140_s25, 3 }
   0x4   : > { %p388_p2 = pnand %p1867_p0, %p387_p1 }
   0x5   : > { %p431_p3 = scmp.lt.s32.totalorder (!%p388_p2), %s1863_s26, 1  ;;  %s2143_s24 = smov (!%p388_p2), 120  }
   0x6   : > { %391 = sbr.rel (%p388_p2) target bundleno = 2160 (0x870), region = 72  ;;  %s2144_s28 = smov (!%p388_p2), 112  }
   0x7   : > { %s2145_s29 = smov (!%p388_p2), 104   ;;  %s2147_s14 = smov (!%p388_p2), 64  }
   0x8   : > { %s2148_s15 = smov (!%p388_p2), 8   ;;  %s2149_s16 = smov (!%p388_p2), 16  }
   0x9   : > { %s2150_s17 = smov (!%p388_p2), 24  }
   0xb   : > { %s3081_s26 = smov (!%p431_p3, %s1863_s26), 1  ;;  %vm452_vm0 = vcmask 261120   ;;  %v2142_v10 = vmov 32.0   ;;  %v1941_v37 = vld [vmem:[%s3033_s3 + $0x8] sm:$0xff]  ;;  %v1940_v41 = vld [vmem:[%s3033_s3] sm:$0xff]  ;;  %vm679_vm14 = vcmask 64512  }
   0xc   : > { %s1938_s27 = sshll.u32 %s3081_s26, 4  ;;  %2044 = vrcp.f32 %v2142_v10  ;;  %596 = vmatpush.bf16.msra.mxu0 %v1941_v37 }
   0xd   : > { %s435_s30 = scalar_lea.vmem %s3030_s0, %s1938_s27  ;;  %s440_s18 = scalar_lea.vmem %s3043_s13, %s1938_s27 }
   0xe   : > { %v1958_v0 = vld [vmem:[%s435_s30 + $0x8] sm:$0xff]   ;;  %v1951_v1 = vld [vmem:[%s435_s30] sm:$0xff]   ;;  %s2146_s30 = smov 96  }
   0xf   : > { %v2237_v2 = vunpack.c.l.bf16 %v1958_v0  ;;  %v2239_v3 = vunpack.c.l.bf16 %v1951_v1  ;;  %v2245_v6 = vunpack.c.h.bf16 %v1958_v0  ;;  %v2247_v7 = vunpack.c.h.bf16 %v1951_v1 }
  0x10   : > { %597 = vmatpush.bf16.msra.mxu0 %v1940_v41 }
  0x11   : > { %v459_v4 = vsel %vm452_vm0, %v2237_v2, 0.0  ;;  %v453_v5 = vsel %vm452_vm0, %v2239_v3, 0.0  ;;  %v462_v8 = vsel %vm452_vm0, %v2245_v6, 0.0  ;;  %v456_v9 = vsel %vm452_vm0, %v2247_v7, 0.0 }
  0x12   : > { %460 = vadd.xlane.f32.xlu1 %v459_v4  ;;  %454 = vadd.xlane.f32.xlu0 %v453_v5  ;;  %v2045_v11 = vpop.eup %2044 }
  0x13   : > { %v466_v12 = vmul.f32 32.0, %v2045_v11  ;;  %vm470_vm1 = vweird.f32 %v2045_v11 }
  0x15   : > { %v467_v13 = vsub.f32 1.0, %v466_v12 }
  0x17   : > { %v468_v14 = vmul.f32 %v2045_v11, %v467_v13 }
  0x19   : > { %v469_v15 = vadd.f32 %v2045_v11, %v468_v14 }
  0x1a   : > { %463 = vadd.xlane.f32.xlu1 %v462_v8  ;;  %457 = vadd.xlane.f32.xlu0 %v456_v9 }
  0x1b   : > { %v2253_v16 = vsel %vm470_vm1, %v2045_v11, %v469_v15  ;;  %v2036_v11 = vld [vmem:[%s3031_s1] ss:$0 sm:$0xff] }
  0x85   : > { %v461_v17 = vpop.xlane.xlu1 %460  ;;  %v455_v18 = vpop.xlane.xlu0 %454 }
  0x86   : > { %v474_v19 = vmul.f32 %v2253_v16, %v461_v17  ;;  %v472_v20 = vmul.f32 %v2253_v16, %v455_v18 }
  0x88   : > { %v2258_v21 = vsub.f32 %v2237_v2, %v474_v19  ;;  %v476_v22 = vsub.f32 %v2239_v3, %v472_v20  ;;  %v2037_v19 = vld [vmem:[%s3032_s2] ss:$0 sm:$0xff] }
  0x8a   : > { %v482_v23 = vmul.f32 %v2258_v21, %v2258_v21  ;;  %v480_v24 = vmul.f32 %v476_v22, %v476_v22 }
  0x8c   : > { %v490_v25 = vsel %vm452_vm0, %v482_v23, 0.0  ;;  %v484_v26 = vsel %vm452_vm0, %v480_v24, 0.0 }
  0x8d   : > { %v464_v27 = vpop.xlane.xlu1 %463  ;;  %491 = vadd.xlane.f32.xlu0 %v490_v25  ;;  %485 = vadd.xlane.f32.xlu2 %v484_v26  ;;  %v458_v28 = vpop.xlane.xlu0 %457 }
  0x8e   : > { %v475_v29 = vmul.f32 %v2253_v16, %v464_v27  ;;  %v473_v30 = vmul.f32 %v2253_v16, %v458_v28 }
  0x90   : > { %v2268_v31 = vsub.f32 %v2245_v6, %v475_v29  ;;  %v477_v32 = vsub.f32 %v2247_v7, %v473_v30 }
  0x92   : > { %v483_v33 = vmul.f32 %v2268_v31, %v2268_v31  ;;  %v481_v34 = vmul.f32 %v477_v32, %v477_v32 }
  0x94   : > { %v493_v35 = vsel %vm452_vm0, %v483_v33, 0.0  ;;  %v487_v36 = vsel %vm452_vm0, %v481_v34, 0.0 }
  0x95   : > { %494 = vadd.xlane.f32.xlu1 %v493_v35  ;;  %488 = vadd.xlane.f32.xlu2 %v487_v36 }
 0x100   : > { %v486_v38 = vpop.xlane.xlu2 %485  ;;  %v492_v40 = vpop.xlane.xlu0 %491 }
 0x101   : > { %v496_v39 = vmul.f32 %v486_v38, %v2253_v16  ;;  %v498_v43 = vmul.f32 %v492_v40, %v2253_v16 }
 0x103   : > { %v500_v42 = vadd.f32 1e-05, %v496_v39  ;;  %v502_v44 = vadd.f32 1e-05, %v498_v43  ;;  %v2038_v39 = vld [vmem:[%s3034_s4] ss:$0 sm:$0xff] }
 0x105   : > { %2046 = vrsqrt.f32 %v500_v42  ;;  %vm510_vm3 = vweird.f32 %v500_v42  ;;  %vm530_vm10 = vweird.f32 %v502_v44 }
 0x106   : > { %2048 = vrsqrt.f32 %v502_v44 }
 0x108   : > { %v495_v45 = vpop.xlane.xlu1 %494  ;;  %v489_v46 = vpop.xlane.xlu2 %488 }
 0x109   : > { %v499_v47 = vmul.f32 %v495_v45, %v2253_v16  ;;  %v497_v48 = vmul.f32 %v489_v46, %v2253_v16 }
 0x10b   : > { %v2047_v49 = vpop.eup %2046  ;;  %v503_v50 = vadd.f32 1e-05, %v499_v47  ;;  %v501_v51 = vadd.f32 1e-05, %v497_v48 }
 0x10c   : > { %v505_v52 = vmul.f32 %v2047_v49, %v500_v42  ;;  %v2049_v55 = vpop.eup %2048  ;;  %vm511_vm2 = vweird.f32 %v2047_v49 }
 0x10d   : > { %2050 = vrsqrt.f32 %v503_v50  ;;  %v525_v61 = vmul.f32 %v2049_v55, %v502_v44  ;;  %vm512_vm4 = vmor %vm510_vm3, %vm511_vm2  ;;  %vm520_vm6 = vweird.f32 %v501_v51  ;;  %vm540_vm8 = vweird.f32 %v503_v50 }
 0x10e   : > { %v506_v53 = vmul.f32 %v2047_v49, %v505_v52  ;;  %2052 = vrsqrt.f32 %v501_v51  ;;  %vm531_vm11 = vweird.f32 %v2049_v55 }
 0x10f   : > { %v526_v4 = vmul.f32 %v2049_v55, %v525_v61  ;;  %vm532_vm13 = vmor %vm530_vm10, %vm531_vm11 }
 0x110   : > { %v507_v54 = vmul.f32 0.5, %v506_v53 }
 0x111   : > { %v527_v12 = vmul.f32 0.5, %v526_v4 }
 0x112   : > { %v508_v56 = vsub.f32 1.5, %v507_v54 }
 0x113   : > { %v2051_v57 = vpop.eup %2050  ;;  %v528_v20 = vsub.f32 1.5, %v527_v12 }
 0x114   : > { %v2053_v58 = vpop.eup %2052  ;;  %v535_v59 = vmul.f32 %v2051_v57, %v503_v50  ;;  %v509_v60 = vmul.f32 %v2047_v49, %v508_v56  ;;  %vm541_vm9 = vweird.f32 %v2051_v57 }
 0x115   : > { %v515_v62 = vmul.f32 %v2053_v58, %v501_v51  ;;  %vm521_vm5 = vweird.f32 %v2053_v58  ;;  %vm542_vm12 = vmor %vm540_vm8, %vm541_vm9  ;;  %v529_v26 = vmul.f32 %v2049_v55, %v528_v20 }
 0x116   : > { %v536_v63 = vmul.f32 %v2051_v57, %v535_v59  ;;  %v513_v1 = vsel %vm512_vm4, %v2047_v49, %v509_v60  ;;  %vm522_vm7 = vmor %vm520_vm6, %vm521_vm5 }
 0x117   : > { %v516_v0 = vmul.f32 %v2053_v58, %v515_v62  ;;  %v544_v10 = vmul.f32 %v513_v1, %v476_v22  ;;  %v533_v29 = vsel %vm532_vm13, %v2049_v55, %v529_v26 }
 0x118   : > { %v537_v8 = vmul.f32 0.5, %v536_v63 }
 0x119   : > { %v517_v5 = vmul.f32 0.5, %v516_v0  ;;  %v551_v18 = vmul.f32 %v2036_v11, %v544_v10 }
 0x11a   : > { %v538_v14 = vsub.f32 1.5, %v537_v8 }
 0x11b   : > { %v518_v9 = vsub.f32 1.5, %v517_v5  ;;  %v558_v24 = vadd.f32 %v2037_v19, %v551_v18 }
 0x11c   : > { %v539_v23 = vmul.f32 %v2051_v57, %v538_v14 }
 0x11d   : > { %v519_v13 = vmul.f32 %v2053_v58, %v518_v9 }
 0x11e   : > { %v543_v28 = vsel %vm542_vm12, %v2051_v57, %v539_v23 }
 0x11f   : > { %v523_v15 = vsel %vm522_vm7, %v2053_v58, %v519_v13  ;;  %v547_v30 = vmul.f32 %v543_v28, %v2268_v31 }
 0x120   : > { %v545_v17 = vmul.f32 %v523_v15, %v477_v32  ;;  %v546_v32 = vmul.f32 %v533_v29, %v2258_v21 }
 0x121   : > { %v554_v33 = vmul.f32 %v2036_v11, %v547_v30 }
 0x122   : > { %v552_v22 = vmul.f32 %v2036_v11, %v545_v17  ;;  %v553_v34 = vmul.f32 %v2036_v11, %v546_v32 }
 0x123   : > { %v561_v35 = vadd.f32 %v2037_v19, %v554_v33 }
 0x124   : > { %v559_v25 = vadd.f32 %v2037_v19, %v552_v22  ;;  %v560_v36 = vadd.f32 %v2037_v19, %v553_v34 }
 0x126   : > { %v562_v27 = vpack.c.bf16 %v559_v25, %v558_v24  ;;  %v563_v37 = vpack.c.bf16 %v561_v35, %v560_v36 }
 0x128   : > { %1880 = vmatmul.msk.bf16.vlgmr.msra.gmra.mxu0 %vm452_vm0, %v562_v27 }
 0x138   : > { %1881 = vmatmul.msk.bf16.gmra.mxu0 %vm452_vm0, %v563_v37 }
 0x1a5   : > { %v599_v38 = vpop.f32.mrf.mxu0 }
 0x1a6   : > { %v600_v40 = vadd.f32 %v2038_v39, %v599_v38 }
 0x1a8   : > { %v649_v43 = vpack.c.bf16 %v600_v40, %v600_v40 }
 0x1aa   : > { %v669_v21 = vunpack.c.l.b16 %v649_v43 }
 0x1ad   : > { %v601_v41 = vpop.f32.mrf.mxu0 }
 0x1ae   : > { %v602_v42 = vadd.f32 %v2038_v39, %v601_v41 }
 0x1b0   : > { %v1986_v44 = vpack.i.bf16 %v602_v42, %v600_v40  ;;  %v650_v31 = vpack.c.bf16 %v602_v42, %v602_v42 }
 0x1b2   : > { %1987 = vrot.lane.b32.xlu1 %v1986_v44, %s2143_s24  ;;  %v670_v45 = vunpack.c.l.b16 %v650_v31 }
 0x1b4   : > { %v2298_v46 = vpack.c.b16 %v670_v45, %v669_v21 }
 0x1b5   : > { %v604_v47 = vpop.f32.mrf.mxu0 }
 0x1b6   : > { %v605_v48 = vadd.f32 %v2038_v39, %v604_v47 }
 0x1b8   : > { %v651_v51 = vpack.c.bf16 %v605_v48, %v605_v48 }
 0x1ba   : > { %v671_v54 = vunpack.c.l.b16 %v651_v51 }
 0x1bd   : > { %v606_v49 = vpop.f32.mrf.mxu0 }
 0x1be   : > { %v607_v50 = vadd.f32 %v2038_v39, %v606_v49 }
 0x1c0   : > { %v1981_v52 = vpack.i.bf16 %v607_v50, %v605_v48  ;;  %v652_v53 = vpack.c.bf16 %v607_v50, %v607_v50 }
 0x1c2   : > { %1982 = vrot.lane.b32.xlu0 %v1981_v52, %s2144_s28  ;;  %1977 = vrot.lane.b32.xlu2 %v1981_v52, %s2143_s24  ;;  %v672_v55 = vunpack.c.l.b16 %v652_v53 }
 0x1c4   : > { %v2300_v56 = vpack.c.b16 %v672_v55, %v671_v54 }
 0x1ca   : > { %1997 = vrot.lane.b32.xlu0 %v1981_v52, %s2145_s29  ;;  %1992 = vrot.lane.b32.xlu2 %v1986_v44, %s2144_s28 }
 0x1d2   : > { %2002 = vrot.lane.b32.xlu2 %v1986_v44, %s2145_s29 }
 0x21c   : > { %v1978_v57 = vpop.permute.xlu2 %1977 }
 0x21d   : > { %v1980_v58 = vunpack.i.h.bf16 %v1978_v57  ;;  %v1979_v59 = vunpack.i.l.bf16 %v1978_v57 }
 0x21f   : > { %v656_v60 = vpack.c.bf16 %v1980_v58, %v1980_v58  ;;  %v655_v61 = vpack.c.bf16 %v1979_v59, %v1979_v59 }
 0x221   : > { %v718_v62 = vunpack.c.l.b16 %v656_v60  ;;  %v717_v63 = vunpack.c.l.b16 %v655_v61 }
 0x223   : > { %v2302_v0 = vpack.c.b16 %v718_v62, %v717_v63 }
 0x224   : > { %v1988_v1 = vpop.permute.xlu1 %1987  ;;  %v1993_v4 = vpop.permute.xlu2 %1992 }
 0x225   : > { %v1990_v5 = vunpack.i.h.bf16 %v1988_v1  ;;  %v1989_v8 = vunpack.i.l.bf16 %v1988_v1  ;;  %v1995_v9 = vunpack.i.h.bf16 %v1993_v4  ;;  %v1994_v10 = vunpack.i.l.bf16 %v1993_v4  ;;  %723 = vrot.lane.b32.xlu1 %v2302_v0, %s2146_s30 }
 0x226   : > { %v846_v1 = vlaneseq }
 0x227   : > { %v654_v11 = vpack.c.bf16 %v1990_v5, %v1990_v5  ;;  %v653_v12 = vpack.c.bf16 %v1989_v8, %v1989_v8  ;;  %v658_v13 = vpack.c.bf16 %v1995_v9, %v1995_v9  ;;  %v657_v14 = vpack.c.bf16 %v1994_v10, %v1994_v10 }
 0x228   : > { %v2354_v4 = vand.u32 127, %v846_v1 }
 0x229   : > { %v716_v15 = vunpack.c.l.b16 %v654_v11  ;;  %v715_v17 = vunpack.c.l.b16 %v653_v12  ;;  %v761_v18 = vunpack.c.l.b16 %v658_v13  ;;  %v760_v19 = vunpack.c.l.b16 %v657_v14 }
 0x22a   : > { %vm848_vm15 = vcmp.lt.s32.totalorder %v2354_v4, 17 }
 0x22b   : > { %v2306_v20 = vpack.c.b16 %v716_v15, %v715_v17  ;;  %v2308_v22 = vpack.c.b16 %v761_v18, %v760_v19 }
 0x22c   : > { %v2003_v23 = vpop.permute.xlu2 %2002 }
 0x22d   : > { %v2005_v24 = vunpack.i.h.bf16 %v2003_v23  ;;  %v2004_v25 = vunpack.i.l.bf16 %v2003_v23  ;;  %721 = vrot.lane.b32.xlu2 %v2306_v20, %s2146_s30  ;;  %766 = vrot.lane.b32.xlu1 %v2308_v22, %s2146_s30 }
 0x22f   : > { %v662_v26 = vpack.c.bf16 %v2005_v24, %v2005_v24  ;;  %v661_v27 = vpack.c.bf16 %v2004_v25, %v2004_v25 }
 0x231   : > { %v806_v28 = vunpack.c.l.b16 %v662_v26  ;;  %v805_v29 = vunpack.c.l.b16 %v661_v27 }
 0x233   : > { %v2314_v30 = vpack.c.b16 %v806_v28, %v805_v29 }
 0x234   : > { %v1983_v32 = vpop.permute.xlu0 %1982 }
 0x235   : > { %v1985_v33 = vunpack.i.h.bf16 %v1983_v32  ;;  %v1984_v34 = vunpack.i.l.bf16 %v1983_v32  ;;  %811 = vrot.lane.b32.xlu2 %v2314_v30, %s2146_s30  ;;  %677 = vrot.lane.b32.xlu1 %v2300_v56, %s2146_s30 }
 0x237   : > { %v660_v35 = vpack.c.bf16 %v1985_v33, %v1985_v33  ;;  %v659_v36 = vpack.c.bf16 %v1984_v34, %v1984_v34 }
 0x239   : > { %v763_v37 = vunpack.c.l.b16 %v660_v35  ;;  %v762_v38 = vunpack.c.l.b16 %v659_v36 }
 0x23b   : > { %v2320_v39 = vpack.c.b16 %v763_v37, %v762_v38 }
 0x23c   : > { %v1998_v40 = vpop.permute.xlu0 %1997 }
 0x23d   : > { %v2000_v41 = vunpack.i.h.bf16 %v1998_v40  ;;  %v1999_v42 = vunpack.i.l.bf16 %v1998_v40  ;;  %768 = vrot.lane.b32.xlu0 %v2320_v39, %s2146_s30 }
 0x23f   : > { %v664_v43 = vpack.c.bf16 %v2000_v41, %v2000_v41  ;;  %v663_v44 = vpack.c.bf16 %v1999_v42, %v1999_v42 }
 0x241   : > { %v808_v31 = vunpack.c.l.b16 %v664_v43  ;;  %v807_v21 = vunpack.c.l.b16 %v663_v44 }
 0x243   : > { %v2324_v45 = vpack.c.b16 %v808_v31, %v807_v21 }
 0x245   : > { %813 = vrot.lane.b32.xlu0 %v2324_v45, %s2146_s30 }
 0x24d   : > { %675 = vrot.lane.b32.xlu0 %v2298_v46, %s2146_s30 }
 0x287   : > { %v722_v49 = vpop.permute.xlu2 %721 }
 0x288   : > { %v732_v51 = vsel %vm679_vm14, %v722_v49, 0 }
 0x28f   : > { %v812_v60 = vpop.permute.xlu2 %811 }
 0x290   : > { %v822_v63 = vsel %vm679_vm14, %v812_v60, 0 }
 0x297   : > { %v724_v47 = vpop.permute.xlu1 %723 }
 0x298   : > { %v735_v48 = vsel %vm679_vm14, %v724_v47, 0 }
 0x299   : > { %743 = vmatpush.bf16.xpose.msra.mxu2 %v735_v48 }
 0x29f   : > { %v767_v50 = vpop.permute.xlu1 %766 }
 0x2a0   : > { %v777_v58 = vsel %vm679_vm14, %v767_v50, 0 }
 0x2a1   : > { %744 = vmatpush.bf16.xpose.msra.mxu2 %v732_v51 }
 0x2a7   : > { %v678_v52 = vpop.permute.xlu1 %677 }
 0x2a8   : > { %1884 = vmatmul.msk.bf16.vlgmr.msra.gmra.mxu2 %vm679_vm14, %v2306_v20  ;;  %v690_v53 = vsel %vm679_vm14, %v678_v52, 0 }
 0x2a9   : > { %698 = vmatpush.bf16.xpose.msra.mxu1 %v690_v53 }
 0x2af   : > { %v769_v54 = vpop.permute.xlu0 %768 }
 0x2b0   : > { %v780_v55 = vsel %vm679_vm14, %v769_v54, 0 }
 0x2b1   : > { %788 = vmatpush.bf16.xpose.msra.mxu3 %v780_v55 }
 0x2b7   : > { %v814_v57 = vpop.permute.xlu0 %813 }
 0x2b8   : > { %1885 = vmatmul.msk.bf16.gmra.mxu2 %vm679_vm14, %v2302_v0  ;;  %v825_v59 = vsel %vm679_vm14, %v814_v57, 0 }
 0x2b9   : > { %789 = vmatpush.bf16.xpose.msra.mxu3 %v777_v58  ;;  %833 = vmatpush.bf16.xpose.msrb.mxu0 %v825_v59 }
 0x2bf   : > { %v676_v61 = vpop.permute.xlu0 %675 }
 0x2c0   : > { %1886 = vmatmul.msk.bf16.vlgmr.msra.gmra.mxu3 %vm679_vm14, %v2308_v22  ;;  %v687_v62 = vsel %vm679_vm14, %v676_v61, 0 }
 0x2c1   : > { %699 = vmatpush.bf16.xpose.msra.mxu1 %v687_v62  ;;  %834 = vmatpush.bf16.xpose.msrb.mxu0 %v822_v63 }
 0x2c8   : > { %1882 = vmatmul.msk.bf16.vlgmr.msra.gmra.mxu1 %vm679_vm14, %v2298_v46  ;;  %1888 = vmatmul.msk.bf16.vlgmr.msrb.gmra.mxu0 %vm679_vm14, %v2314_v30 }
 0x2d0   : > { %1887 = vmatmul.msk.bf16.gmra.mxu3 %vm679_vm14, %v2320_v39 }
 0x2d8   : > { %1883 = vmatmul.msk.bf16.gmra.mxu1 %vm679_vm14, %v2300_v56  ;;  %1889 = vmatmul.msk.bf16.gmra.mxu0 %vm679_vm14, %v2324_v45 }
 0x32b   : > { %v746_v10 = vpop.f32.mrf.mxu2 }
 0x32c   : > { %v855_v42 = vsel %vm848_vm15, %v746_v10, -1e+30 }
 0x32d   : > { %v879_v31 = vsel %vm452_vm0, %v855_v42, -inf }
 0x333   : > { %v748_v15 = vpop.f32.mrf.mxu2 }
 0x334   : > { %v2383_v27 = vsel %vm848_vm15, %v748_v15, -1e+30 }
 0x335   : > { %v882_v35 = vsel %vm452_vm0, %v2383_v27, -inf }
 0x33b   : > { %v751_v33 = vpop.f32.mrf.mxu2 }
 0x33c   : > { %v2435_v57 = vsel %vm848_vm15, %v751_v33, -1e+30 }
 0x33d   : > { %v885_v59 = vsel %vm452_vm0, %v2435_v57, -inf }
 0x343   : > { %v791_v18 = vpop.f32.mrf.mxu3  ;;  %v753_v21 = vpop.f32.mrf.mxu2 }
 0x344   : > { %v2387_v28 = vsel %vm848_vm15, %v791_v18, -1e+30  ;;  %v2413_v48 = vsel %vm848_vm15, %v753_v21, -1e+30 }
 0x345   : > { %v701_v5 = vpop.f32.mrf.mxu1  ;;  %v836_v11 = vpop.f32.mrf.mxu0  ;;  %v891_v36 = vsel %vm452_vm0, %v2387_v28, -inf  ;;  %v888_v51 = vsel %vm452_vm0, %v2413_v48, -inf }
 0x346   : > { %v2359_v8 = vsel %vm848_vm15, %v701_v5, -1e+30  ;;  %v2371_v17 = vsel %vm848_vm15, %v836_v11, -1e+30 }
 0x347   : > { %v867_v9 = vsel %vm452_vm0, %v2359_v8, -inf  ;;  %v903_v25 = vsel %vm452_vm0, %v2371_v17, -inf }
 0x348   : > { %868 = vmax.xlane.f32.xlu2 %v867_v9 }
 0x34b   : > { %v793_v34 = vpop.f32.mrf.mxu3 }
 0x34c   : > { %v2421_v50 = vsel %vm848_vm15, %v793_v34, -1e+30 }
 0x34d   : > { %v703_v12 = vpop.f32.mrf.mxu1  ;;  %v838_v24 = vpop.f32.mrf.mxu0  ;;  %v894_v53 = vsel %vm452_vm0, %v2421_v50, -inf }
 0x34e   : > { %v2365_v13 = vsel %vm848_vm15, %v703_v12, -1e+30  ;;  %v864_v40 = vsel %vm848_vm15, %v838_v24, -1e+30 }
 0x34f   : > { %v870_v14 = vsel %vm452_vm0, %v2365_v13, -inf  ;;  %v906_v44 = vsel %vm452_vm0, %v864_v40, -inf }
 0x350   : > { %871 = vmax.xlane.f32.xlu1 %v870_v14 }
 0x353   : > { %v796_v47 = vpop.f32.mrf.mxu3 }
 0x354   : > { %v2417_v49 = vsel %vm848_vm15, %v796_v47, -1e+30 }
 0x355   : > { %v706_v19 = vpop.f32.mrf.mxu1  ;;  %v841_v38 = vpop.f32.mrf.mxu0  ;;  %v897_v52 = vsel %vm452_vm0, %v2417_v49, -inf }
 0x356   : > { %v2375_v23 = vsel %vm848_vm15, %v706_v19, -1e+30  ;;  %v2403_v41 = vsel %vm848_vm15, %v841_v38, -1e+30 }
 0x357   : > { %v873_v26 = vsel %vm452_vm0, %v2375_v23, -inf  ;;  %v909_v43 = vsel %vm452_vm0, %v2403_v41, -inf }
 0x358   : > { %904 = vmax.xlane.f32.xlu1 %v903_v25  ;;  %874 = vmax.xlane.f32.xlu0 %v873_v26 }
 0x35b   : > { %v798_v60 = vpop.f32.mrf.mxu3 }
 0x35c   : > { %v2443_v61 = vsel %vm848_vm15, %v798_v60, -1e+30 }
 0x35d   : > { %v708_v29 = vpop.f32.mrf.mxu1  ;;  %v843_v54 = vpop.f32.mrf.mxu0  ;;  %v900_v62 = vsel %vm452_vm0, %v2443_v61, -inf }
 0x35e   : > { %v2391_v32 = vsel %vm848_vm15, %v708_v29, -1e+30  ;;  %v2431_v55 = vsel %vm848_vm15, %v843_v54, -1e+30 }
 0x35f   : > { %v876_v37 = vsel %vm452_vm0, %v2391_v32, -inf  ;;  %v912_v58 = vsel %vm452_vm0, %v2431_v55, -inf }
 0x360   : > { %883 = vmax.xlane.f32.xlu1 %v882_v35  ;;  %892 = vmax.xlane.f32.xlu0 %v891_v36 }
 0x361   : > { %877 = vmax.xlane.f32.xlu2 %v876_v37 }
 0x368   : > { %910 = vmax.xlane.f32.xlu1 %v909_v43  ;;  %907 = vmax.xlane.f32.xlu0 %v906_v44 }
 0x369   : > { %880 = vmax.xlane.f32.xlu2 %v879_v31 }
 0x370   : > { %889 = vmax.xlane.f32.xlu1 %v888_v51  ;;  %898 = vmax.xlane.f32.xlu0 %v897_v52 }
 0x371   : > { %895 = vmax.xlane.f32.xlu2 %v894_v53 }
 0x378   : > { %913 = vmax.xlane.f32.xlu0 %v912_v58 }
 0x379   : > { %886 = vmax.xlane.f32.xlu2 %v885_v59 }
 0x381   : > { %901 = vmax.xlane.f32.xlu2 %v900_v62 }
 0x389   : > { %1318 = vrot.lane.b32.xlu1 %v2306_v20, %s2147_s14 }
 0x38c   : > { %1320 = vrot.lane.b32.xlu0 %v2302_v0, %s2147_s14 }
 0x391   : > { %1359 = vrot.lane.b32.xlu1 %v2308_v22, %s2147_s14 }
 0x399   : > { %1361 = vrot.lane.b32.xlu2 %v2320_v39, %s2147_s14  ;;  %1402 = vrot.lane.b32.xlu1 %v2324_v45, %s2147_s14 }
 0x3bb   : > { %v2461_v5 = vpop.xlane.xlu2 %868 }
 0x3c3   : > { %v2457_v63 = vpop.xlane.xlu1 %871 }
 0x3cb   : > { %v905_v1 = vpop.xlane.xlu1 %904  ;;  %v2459_v4 = vpop.xlane.xlu0 %874 }
 0x3cc   : > { %v927_v20 = vsub.f32 %v2371_v17, %v905_v1  ;;  %v917_v59 = vsub.f32 %v2375_v23, %v2459_v4 }
 0x3ce   : > { %v955_v9 = vmul.f32 1.442695, %v927_v20  ;;  %v935_v20 = vmul.f32 1.442695, %v917_v59 }
 0x3d0   : > { %2054 = vpow2.f32 %v955_v9 }
 0x3d3   : > { %v884_v0 = vpop.xlane.xlu1 %883  ;;  %v893_v10 = vpop.xlane.xlu0 %892 }
 0x3d4   : > { %v920_v22 = vsub.f32 %v2383_v27, %v884_v0  ;;  %v923_v39 = vsub.f32 %v2387_v28, %v893_v10  ;;  %v2466_v11 = vpop.xlane.xlu2 %877 }
 0x3d6   : > { %v2468_v45 = vpop.eup %2054  ;;  %v941_v12 = vmul.f32 1.442695, %v920_v22  ;;  %v947_v14 = vmul.f32 1.442695, %v923_v39 }
 0x3d7   : > { %v999_v15 = vsel %vm452_vm0, %v2468_v45, 0.0 }
 0x3d8   : > { %2056 = vpow2.f32 %v941_v12  ;;  %1000 = vadd.xlane.f32.xlu2 %v999_v15  ;;  %v916_v12 = vsub.f32 %v2365_v13, %v2457_v63 }
 0x3d9   : > { %2058 = vpow2.f32 %v947_v14 }
 0x3db   : > { %v908_v17 = vpop.xlane.xlu0 %907  ;;  %v911_v34 = vpop.xlane.xlu1 %910 }
 0x3dc   : > { %v928_v18 = vsub.f32 %v864_v40, %v908_v17  ;;  %v881_v19 = vpop.xlane.xlu2 %880  ;;  %v929_v43 = vsub.f32 %v2403_v41, %v911_v34  ;;  %v933_v17 = vmul.f32 1.442695, %v916_v12 }
 0x3dd   : > { %v919_v24 = vsub.f32 %v855_v42, %v881_v19 }
 0x3de   : > { %v2472_v25 = vpop.eup %2056  ;;  %v957_v26 = vmul.f32 1.442695, %v928_v18 }
 0x3df   : > { %v2474_v27 = vpop.eup %2058  ;;  %v939_v28 = vmul.f32 1.442695, %v919_v24  ;;  %v978_v29 = vsel %vm452_vm0, %v2472_v25, 0.0 }
 0x3e0   : > { %v987_v33 = vsel %vm452_vm0, %v2474_v27, 0.0  ;;  %979 = vadd.xlane.f32.xlu2 %v978_v29  ;;  %2060 = vpow2.f32 %v957_v26  ;;  %v918_v26 = vsub.f32 %v2391_v32, %v2466_v11 }
 0x3e1   : > { %988 = vadd.xlane.f32.xlu1 %v987_v33  ;;  %2062 = vpow2.f32 %v939_v28 }
 0x3e3   : > { %v899_v35 = vpop.xlane.xlu0 %898  ;;  %v890_v53 = vpop.xlane.xlu1 %889 }
 0x3e4   : > { %v925_v36 = vsub.f32 %v2417_v49, %v899_v35  ;;  %v896_v37 = vpop.xlane.xlu2 %895  ;;  %v959_v49 = vmul.f32 1.442695, %v929_v43  ;;  %v922_v1 = vsub.f32 %v2413_v48, %v890_v53  ;;  %v937_v35 = vmul.f32 1.442695, %v918_v26 }
 0x3e5   : > { %v924_v38 = vsub.f32 %v2421_v50, %v896_v37 }
 0x3e6   : > { %v951_v40 = vmul.f32 1.442695, %v925_v36  ;;  %v2482_v42 = vpop.eup %2060  ;;  %v945_v9 = vmul.f32 1.442695, %v922_v1 }
 0x3e7   : > { %v949_v44 = vmul.f32 1.442695, %v924_v38  ;;  %v2485_v31 = vpop.eup %2062  ;;  %v1002_v21 = vsel %vm452_vm0, %v2482_v42, 0.0 }
 0x3e8   : > { %2064 = vpow2.f32 %v951_v40  ;;  %v975_v47 = vsel %vm452_vm0, %v2485_v31, 0.0  ;;  %v915_v40 = vsub.f32 %v2359_v8, %v2461_v5 }
 0x3e9   : > { %1003 = vadd.xlane.f32.xlu1 %v1002_v21  ;;  %2066 = vpow2.f32 %v949_v44  ;;  %976 = vadd.xlane.f32.xlu0 %v975_v47 }
 0x3ea   : > { %2068 = vpow2.f32 %v959_v49  ;;  %v931_v43 = vmul.f32 1.442695, %v915_v40 }
 0x3eb   : > { %v914_v50 = vpop.xlane.xlu0 %913 }
 0x3ec   : > { %v930_v51 = vsub.f32 %v2431_v55, %v914_v50  ;;  %v887_v52 = vpop.xlane.xlu2 %886 }
 0x3ed   : > { %v921_v41 = vsub.f32 %v2435_v57, %v887_v52 }
 0x3ee   : > { %v961_v54 = vmul.f32 1.442695, %v930_v51  ;;  %v2493_v58 = vpop.eup %2064 }
 0x3ef   : > { %v943_v60 = vmul.f32 1.442695, %v921_v41  ;;  %v2497_v62 = vpop.eup %2066  ;;  %v993_v55 = vsel %vm452_vm0, %v2493_v58, 0.0 }
 0x3f0   : > { %2070 = vpow2.f32 %v961_v54  ;;  %994 = vadd.xlane.f32.xlu2 %v993_v55  ;;  %v990_v57 = vsel %vm452_vm0, %v2497_v62, 0.0  ;;  %v2504_v23 = vpop.eup %2068 }
 0x3f1   : > { %2072 = vpow2.f32 %v943_v60  ;;  %991 = vadd.xlane.f32.xlu0 %v990_v57 }
 0x3f2   : > { %2074 = vpow2.f32 %v935_v20 }
 0x3f3   : > { %2076 = vpow2.f32 %v945_v9 }
 0x3f4   : > { %v902_v0 = vpop.xlane.xlu2 %901 }
 0x3f5   : > { %v926_v4 = vsub.f32 %v2443_v61, %v902_v0  ;;  %v1005_v61 = vsel %vm452_vm0, %v2504_v23, 0.0 }
 0x3f6   : > { %v2507_v10 = vpop.eup %2070 }
 0x3f7   : > { %v2509_v48 = vpop.eup %2072  ;;  %v953_v22 = vmul.f32 1.442695, %v926_v4  ;;  %v1008_v39 = vsel %vm452_vm0, %v2507_v10, 0.0 }
 0x3f8   : > { %v981_v14 = vsel %vm452_vm0, %v2509_v48, 0.0  ;;  %1009 = vadd.xlane.f32.xlu2 %v1008_v39  ;;  %v2519_v19 = vpop.eup %2074 }
 0x3f9   : > { %2078 = vpow2.f32 %v953_v22  ;;  %982 = vadd.xlane.f32.xlu1 %v981_v14  ;;  %1006 = vadd.xlane.f32.xlu0 %v1005_v61  ;;  %v2521_v24 = vpop.eup %2076  ;;  %v969_v28 = vsel %vm452_vm0, %v2519_v19, 0.0 }
 0x3fa   : > { %2080 = vpow2.f32 %v933_v17  ;;  %v984_v33 = vsel %vm452_vm0, %v2521_v24, 0.0 }
 0x3fb   : > { %v1319_v15 = vpop.permute.xlu1 %1318  ;;  %2082 = vpow2.f32 %v937_v35 }
 0x3fc   : > { %v1362_v18 = vpop.permute.xlu2 %1361  ;;  %2084 = vpow2.f32 %v931_v43 }
 0x3fd   : > { %1377 = vmatpush.bf16.msrb.mxu3 %v1362_v18 }
 0x3fe   : > { %v1321_v13 = vpop.permute.xlu0 %1320 }
 0x3ff   : > { %v2523_v63 = vpop.eup %2078  ;;  %1336 = vmatpush.bf16.msrb.mxu2 %v1321_v13 }
 0x400   : > { %v996_v29 = vsel %vm452_vm0, %v2523_v63, 0.0  ;;  %970 = vadd.xlane.f32.xlu2 %v969_v28  ;;  %v2533_v36 = vpop.eup %2080 }
 0x401   : > { %997 = vadd.xlane.f32.xlu1 %v996_v29  ;;  %985 = vadd.xlane.f32.xlu0 %v984_v33  ;;  %v966_v32 = vsel %vm452_vm0, %v2533_v36, 0.0  ;;  %v2537_v37 = vpop.eup %2082 }
 0x402   : > { %v972_v38 = vsel %vm452_vm0, %v2537_v37, 0.0  ;;  %v2549_v44 = vpop.eup %2084 }
 0x403   : > { %v1360_v34 = vpop.permute.xlu1 %1359  ;;  %1337 = vmatpush.bf16.msrb.mxu2 %v1319_v15  ;;  %v963_v21 = vsel %vm452_vm0, %v2549_v44, 0.0 }
 0x404   : > { %1378 = vmatpush.bf16.msrb.mxu3 %v1360_v34 }
 0x409   : > { %967 = vadd.xlane.f32.xlu0 %v966_v32 }
 0x40b   : > { %v1403_v11 = vpop.permute.xlu1 %1402 }
 0x40c   : > { %1418 = vmatpush.bf16.msra.mxu0 %v1403_v11 }
 0x411   : > { %973 = vadd.xlane.f32.xlu0 %v972_v38 }
 0x418   : > { %1279 = vrot.lane.b32.xlu2 %v2300_v56, %s2147_s14 }
 0x41a   : > { %1400 = vrot.lane.b32.xlu1 %v2314_v30, %s2147_s14 }
 0x425   : > { %1277 = vrot.lane.b32.xlu0 %v2298_v46, %s2147_s14 }
 0x444   : > { %964 = vadd.xlane.f32.xlu1 %v963_v21 }
 0x44b   : > { %v1001_v47 = vpop.xlane.xlu2 %1000 }
 0x44c   : > { %2086 = vrcp.f32 %v1001_v47  ;;  %v1200_v1 = vand.u32 2147483647, %v1001_v47  ;;  %v1202_v55 = vand.u32 2147483648, %v1001_v47  ;;  %vm1196_vm2 = vweird.f32 %v1001_v47 }
 0x44e   : > { %vm1201_vm4 = vcmp.eq.f32.partialorder %v1200_v1, 8.507059e+37  ;;  %v1203_v39 = vor.u32 1.1754944e-38, %v1202_v55 }
 0x452   : > { %v2087_v56 = vpop.eup %2086 }
 0x453   : > { %v1192_v49 = vmul.f32 %v2087_v56, %v1001_v47  ;;  %v980_v50 = vpop.xlane.xlu2 %979  ;;  %vm1197_vm1 = vweird.f32 %v2087_v56 }
 0x454   : > { %v2553_v30 = vpop.xlane.xlu1 %988  ;;  %2088 = vrcp.f32 %v980_v50  ;;  %vm2569_vm3 = vmor %vm1196_vm2, %vm1197_vm1  ;;  %vm1091_vm5 = vweird.f32 %v980_v50  ;;  %v1095_v15 = vand.u32 2147483647, %v980_v50  ;;  %v1097_v33 = vand.u32 2147483648, %v980_v50 }
 0x455   : > { %2090 = vrcp.f32 %v2553_v30  ;;  %v1193_v46 = vsub.f32 1.0, %v1192_v49  ;;  %v1140_v29 = vand.u32 2147483647, %v2553_v30  ;;  %vm1136_vm9 = vweird.f32 %v2553_v30 }
 0x456   : > { %v1142_v38 = vand.u32 2147483648, %v2553_v30  ;;  %vm1096_vm13 = vcmp.eq.f32.partialorder %v1095_v15, 8.507059e+37  ;;  %v1098_v49 = vor.u32 1.1754944e-38, %v1097_v33 }
 0x457   : > { %v1194_v51 = vmul.f32 %v2087_v56, %v1193_v46  ;;  %vm1141_vm1 = vcmp.eq.f32.partialorder %v1140_v29, 8.507059e+37 }
 0x459   : > { %v1195_v60 = vadd.f32 %v2087_v56, %v1194_v51 }
 0x45a   : > { %v2556_v8 = vpop.eup %2088 }
 0x45b   : > { %v2558_v5 = vpop.eup %2090  ;;  %v1087_v52 = vmul.f32 %v2556_v8, %v980_v50  ;;  %v1199_v4 = vsel %vm2569_vm3, %v2087_v56, %v1195_v60  ;;  %vm1092_vm6 = vweird.f32 %v2556_v8 }
 0x45c   : > { %v1132_v53 = vmul.f32 %v2558_v5, %v2553_v30  ;;  %v2563_v41 = vpop.xlane.xlu1 %1003  ;;  %v2566_v54 = vpop.xlane.xlu0 %976  ;;  %v1204_v13 = vsel %vm1201_vm4, %v1203_v39, %v1199_v4  ;;  %vm1137_vm7 = vweird.f32 %v2558_v5  ;;  %vm2599_vm10 = vmor %vm1091_vm5, %vm1092_vm6 }
 0x45d   : > { %2092 = vrcp.f32 %v2563_v41  ;;  %v1088_v59 = vsub.f32 1.0, %v1087_v52  ;;  %v1205_v11 = vmul.f32 %v2468_v45, %v1204_v13  ;;  %v1217_v43 = vand.u32 2147483648, %v2563_v41  ;;  %vm2604_vm11 = vmor %vm1136_vm9, %vm1137_vm7 }
 0x45e   : > { %2094 = vrcp.f32 %v2566_v54  ;;  %v1133_v57 = vsub.f32 1.0, %v1132_v53  ;;  %vm1211_vm12 = vweird.f32 %v2563_v41  ;;  %v1215_v56 = vand.u32 2147483647, %v2563_v41 }
 0x45f   : > { %v1089_v9 = vmul.f32 %v2556_v8, %v1088_v59  ;;  %v1143_v59 = vor.u32 1.1754944e-38, %v1142_v38  ;;  %v1218_v1 = vor.u32 1.1754944e-38, %v1217_v43  ;;  %v1080_v20 = vand.u32 2147483647, %v2566_v54 }
 0x460   : > { %v1134_v12 = vmul.f32 %v2558_v5, %v1133_v57  ;;  %vm1216_vm2 = vcmp.eq.f32.partialorder %v1215_v56, 8.507059e+37  ;;  %vm1076_vm4 = vweird.f32 %v2566_v54 }
 0x461   : > { %v1090_v26 = vadd.f32 %v2556_v8, %v1089_v9  ;;  %v1082_v9 = vand.u32 2147483648, %v2566_v54  ;;  %vm2658_vm6 = vcmp.eq.f32.partialorder %v1080_v20, 8.507059e+37 }
 0x462   : > { %v1135_v34 = vadd.f32 %v2558_v5, %v1134_v12 }
 0x463   : > { %v2093_v0 = vpop.eup %2092  ;;  %v2580_v61 = vpop.xlane.xlu2 %994  ;;  %v1094_v45 = vsel %vm2599_vm10, %v2556_v8, %v1090_v26 }
 0x464   : > { %v2576_v22 = vpop.eup %2094  ;;  %v1207_v14 = vmul.f32 %v2093_v0, %v2563_v41  ;;  %v2585_v18 = vpop.xlane.xlu0 %991  ;;  %vm1212_vm8 = vweird.f32 %v2093_v0  ;;  %v1139_v46 = vsel %vm2604_vm11, %v2558_v5, %v1135_v34  ;;  %v1099_v60 = vsel %vm1096_vm13, %v1098_v49, %v1094_v45 }
 0x465   : > { %v1072_v17 = vmul.f32 %v2576_v22, %v2566_v54  ;;  %2096 = vrcp.f32 %v2585_v18  ;;  %vm2613_vm15 = vmor %vm1211_vm12, %vm1212_vm8  ;;  %v1263_v5 = vpack.c.bf16 %v1205_v11, %v1205_v11  ;;  %vm1077_vm3 = vweird.f32 %v2576_v22 }
 0x466   : > { %v1208_v28 = vsub.f32 1.0, %v1207_v14  ;;  %2098 = vrcp.f32 %v2580_v61  ;;  %v1100_v15 = vmul.f32 %v2472_v25, %v1099_v60  ;;  %v1157_v13 = vand.u32 2147483648, %v2585_v18  ;;  %vm2654_vm5 = vmor %vm1076_vm4, %vm1077_vm3 }
 0x467   : > { %v1073_v32 = vsub.f32 1.0, %v1072_v17  ;;  %v1155_v17 = vand.u32 2147483647, %v2585_v18  ;;  %v1172_v26 = vand.u32 2147483648, %v2580_v61  ;;  %v1083_v54 = vor.u32 1.1754944e-38, %v1082_v9 }
 0x468   : > { %v1209_v35 = vmul.f32 %v2093_v0, %v1208_v28  ;;  %v2647_v28 = vunpack.c.l.b16 %v1263_v5  ;;  %vm1151_vm7 = vweird.f32 %v2585_v18  ;;  %v1256_v11 = vpack.c.bf16 %v1100_v15, %v1100_v15 }
 0x469   : > { %v1074_v51 = vmul.f32 %v2576_v22, %v1073_v32  ;;  %vm2670_vm8 = vcmp.eq.f32.partialorder %v1155_v17, 8.507059e+37  ;;  %v1158_v40 = vor.u32 1.1754944e-38, %v1157_v13  ;;  %v1170_v43 = vand.u32 2147483647, %v2580_v61 }
 0x46a   : > { %v1210_v47 = vadd.f32 %v2093_v0, %v1209_v35  ;;  %v2675_v21 = vor.u32 1.1754944e-38, %v1172_v26  ;;  %vm1166_vm13 = vweird.f32 %v2580_v61 }
 0x46b   : > { %v2617_v30 = vpop.eup %2096  ;;  %v2627_v53 = vpop.xlane.xlu2 %1009  ;;  %v1075_v12 = vadd.f32 %v2576_v22, %v1074_v51 }
 0x46c   : > { %v1214_v8 = vsel %vm2613_vm15, %v2093_v0, %v1210_v47  ;;  %v2625_v52 = vpop.xlane.xlu1 %982  ;;  %v2629_v41 = vpop.eup %2098  ;;  %v1147_v55 = vmul.f32 %v2617_v30, %v2585_v18  ;;  %v1144_v0 = vsel %vm1141_vm1, %v1143_v59, %v1139_v46  ;;  %vm1152_vm9 = vweird.f32 %v2617_v30 }
 0x46d   : > { %v2633_v57 = vpop.xlane.xlu0 %1006  ;;  %v1219_v4 = vsel %vm1216_vm2, %v1218_v1, %v1214_v8  ;;  %v1162_v14 = vmul.f32 %v2629_v41, %v2580_v61  ;;  %2100 = vrcp.f32 %v2625_v52  ;;  %v2652_v33 = vmul.f32 %v2474_v27, %v1144_v0  ;;  %vm2710_vm12 = vmor %vm1151_vm7, %vm1152_vm9 }
 0x46e   : > { %v1148_v39 = vsub.f32 1.0, %v1147_v55  ;;  %v1220_v29 = vmul.f32 %v2482_v42, %v1219_v4  ;;  %2102 = vrcp.f32 %v2633_v57  ;;  %v1079_v42 = vsel %vm2654_vm5, %v2576_v22, %v1075_v12 }
 0x46f   : > { %2104 = vrcp.f32 %v2627_v53  ;;  %v1163_v27 = vsub.f32 1.0, %v1162_v14  ;;  %v1232_v49 = vand.u32 2147483648, %v2633_v57  ;;  %v1259_v50 = vpack.c.bf16 %v2652_v33, %v2652_v33 }
 0x470   : > { %v1149_v35 = vmul.f32 %v2617_v30, %v1148_v39  ;;  %v1264_v56 = vpack.c.bf16 %v1220_v29, %v1220_v29  ;;  %v1084_v46 = vsel %vm2658_vm6, %v1083_v54, %v1079_v42  ;;  %v1110_v1 = vand.u32 2147483647, %v2625_v52 }
 0x471   : > { %v1164_v60 = vmul.f32 %v2629_v41, %v1163_v27  ;;  %v2698_v55 = vunpack.c.l.b16 %v1256_v11  ;;  %vm1167_vm10 = vweird.f32 %v2629_v41  ;;  %v1230_v20 = vand.u32 2147483647, %v2633_v57 }
 0x472   : > { %v1150_v8 = vadd.f32 %v2617_v30, %v1149_v35  ;;  %vm1106_vm11 = vweird.f32 %v2625_v52  ;;  %v1112_v0 = vand.u32 2147483648, %v2625_v52  ;;  %v2706_v4 = vunpack.c.l.b16 %v1264_v56  ;;  %vm2789_vm9 = vmor %vm1166_vm13, %vm1167_vm10 }
 0x473   : > { %v2668_v32 = vpop.xlane.xlu2 %970  ;;  %v2681_v22 = vpop.eup %2100  ;;  %v2714_v12 = vor.u32 1.1754944e-38, %v1232_v49  ;;  %v1247_v14 = vand.u32 2147483648, %v2627_v53  ;;  %v1085_v15 = vmul.f32 %v2485_v31, %v1084_v46  ;;  %v2729_v29 = vadd.f32 %v2629_v41, %v1164_v60 }
 0x474   : > { %v2679_v47 = vpop.xlane.xlu1 %997  ;;  %v1102_v51 = vmul.f32 %v2681_v22, %v2625_v52  ;;  %v2693_v59 = vpop.eup %2102  ;;  %v1154_v17 = vsel %vm2710_vm12, %v2617_v30, %v1150_v8  ;;  %vm2731_vm15 = vcmp.eq.f32.partialorder %v1110_v1, 8.507059e+37  ;;  %v1245_v33 = vand.u32 2147483647, %v2627_v53 }
 0x475   : > { %v2677_v45 = vpop.xlane.xlu0 %985  ;;  %v2700_v5 = vpop.eup %2104  ;;  %v1222_v13 = vmul.f32 %v2693_v59, %v2633_v57  ;;  %vm1107_vm1 = vweird.f32 %v2681_v22  ;;  %v1113_v54 = vor.u32 1.1754944e-38, %v1112_v0  ;;  %v1159_v11 = vsel %vm2670_vm8, %v1158_v40, %v1154_v17 }
 0x476   : > { %2106 = vrcp.f32 %v2677_v45  ;;  %v1103_v9 = vsub.f32 1.0, %v1102_v51  ;;  %v1237_v30 = vmul.f32 %v2700_v5, %v2627_v53  ;;  %v2748_v56 = vor.u32 1.1754944e-38, %v1247_v14  ;;  %vm2762_vm5 = vmor %vm1106_vm11, %vm1107_vm1 }
 0x477   : > { %2108 = vrcp.f32 %v2679_v47  ;;  %v1255_v49 = vpack.c.bf16 %v1085_v15, %v1085_v15  ;;  %v1353_v46 = vunpack.c.l.b16 %v1259_v50  ;;  %vm2750_vm2 = vcmp.eq.f32.partialorder %v1170_v43, 8.507059e+37 }
 0x478   : > { %v1104_v18 = vmul.f32 %v2681_v22, %v1103_v9  ;;  %2110 = vrcp.f32 %v2668_v32  ;;  %v1223_v51 = vsub.f32 1.0, %v1222_v13  ;;  %vm1121_vm3 = vweird.f32 %v2677_v45 }
 0x479   : > { %vm1227_vm4 = vweird.f32 %v2693_v59  ;;  %v1238_v40 = vsub.f32 1.0, %v1237_v30  ;;  %v1125_v43 = vand.u32 2147483647, %v2677_v45  ;;  %v1127_v50 = vand.u32 2147483648, %v2677_v45 }
 0x47a   : > { %v1105_v25 = vadd.f32 %v2681_v22, %v1104_v18  ;;  %v1312_v9 = vunpack.c.l.b16 %v1255_v49  ;;  %v1160_v15 = vmul.f32 %v2497_v62, %v1159_v11  ;;  %vm1226_vm6 = vweird.f32 %v2633_v57 }
 0x47b   : > { %v1280_v34 = vpop.permute.xlu2 %1279  ;;  %vm1181_vm7 = vweird.f32 %v2679_v47  ;;  %v1185_v17 = vand.u32 2147483647, %v2679_v47  ;;  %v1224_v30 = vmul.f32 %v2693_v59, %v1223_v51  ;;  %vm1241_vm8 = vweird.f32 %v2627_v53 }
 0x47c   : > { %v2726_v26 = vpop.eup %2106  ;;  %1295 = vmatpush.bf16.msrb.mxu1 %v1280_v34  ;;  %v1109_v52 = vsel %vm2762_vm5, %v2681_v22, %v1105_v25  ;;  %v1316_v18 = vpack.c.b16 %v2698_v55, %v1312_v9  ;;  %v1187_v34 = vand.u32 2147483648, %v2679_v47  ;;  %v1260_v22 = vpack.c.bf16 %v1160_v15, %v1160_v15 }
 0x47d   : > { %v1117_v35 = vmul.f32 %v2726_v26, %v2677_v45  ;;  %v2742_v42 = vpop.xlane.xlu0 %967  ;;  %v2744_v27 = vpop.eup %2108  ;;  %vm1122_vm11 = vweird.f32 %v2726_v26  ;;  %v1114_v11 = vsel %vm2731_vm15, %v1113_v54, %v1109_v52  ;;  %v1239_v49 = vmul.f32 %v2700_v5, %v1238_v40 }
 0x47e   : > { %v1177_v1 = vmul.f32 %v2744_v27, %v2679_v47  ;;  %v2768_v0 = vpop.eup %2110  ;;  %1892 = vmatmul.msk.bf16.vlgmr.msrb.gmra.mxu2 %vm452_vm0, %v1316_v18  ;;  %vm1242_vm12 = vweird.f32 %v2700_v5  ;;  %v1354_v51 = vunpack.c.l.b16 %v1260_v22  ;;  %vm2808_vm10 = vcmp.eq.f32.partialorder %v1230_v20, 8.507059e+37  ;;  %vm1123_vm5 = vmor %vm1121_vm3, %vm1122_vm11 }
 0x47f   : > { %v1118_v60 = vsub.f32 1.0, %v1117_v35  ;;  %v1042_v13 = vmul.f32 %v2768_v0, %v2668_v32  ;;  %vm2812_vm13 = vcmp.eq.f32.partialorder %v1245_v33, 8.507059e+37  ;;  %vm2816_vm15 = vcmp.eq.f32.partialorder %v1125_v43, 8.507059e+37 }
 0x480   : > { %v1178_v14 = vsub.f32 1.0, %v1177_v1  ;;  %vm1182_vm1 = vweird.f32 %v2744_v27  ;;  %v1128_v20 = vor.u32 1.1754944e-38, %v1127_v50  ;;  %v1115_v33 = vmul.f32 %v2509_v48, %v1114_v11 }
 0x481   : > { %v1119_v39 = vmul.f32 %v2726_v26, %v1118_v60  ;;  %v1043_v55 = vsub.f32 1.0, %v1042_v13  ;;  %v1169_v60 = vsel %vm2789_vm9, %v2629_v41, %v2729_v29  ;;  %v1225_v41 = vadd.f32 %v2693_v59, %v1224_v30  ;;  %vm1183_vm9 = vmor %vm1181_vm7, %vm1182_vm1 }
 0x482   : > { %v1179_v62 = vmul.f32 %v2744_v27, %v1178_v14  ;;  %v1357_v29 = vpack.c.b16 %v1354_v51, %v1353_v46  ;;  %v1188_v40 = vor.u32 1.1754944e-38, %v1187_v34  ;;  %v1240_v14 = vadd.f32 %v2700_v5, %v1239_v49 }
 0x483   : > { %v1120_v35 = vadd.f32 %v2726_v26, %v1119_v39  ;;  %v1044_v43 = vmul.f32 %v2768_v0, %v1043_v55  ;;  %v1174_v39 = vsel %vm2750_vm2, %v2675_v21, %v1169_v60  ;;  %v1050_v45 = vand.u32 2147483647, %v2668_v32  ;;  %vm2848_vm2 = vmor %vm1226_vm6, %vm1227_vm4 }
 0x484   : > { %v1180_v38 = vadd.f32 %v2744_v27, %v1179_v62  ;;  %v1052_v46 = vand.u32 2147483648, %v2668_v32  ;;  %1894 = vmatmul.msk.bf16.vlgmr.msrb.gmra.mxu3 %vm452_vm0, %v1357_v29  ;;  %vm1186_vm3 = vcmp.eq.f32.partialorder %v1185_v17, 8.507059e+37  ;;  %v1257_v50 = vpack.c.bf16 %v1115_v33, %v1115_v33 }
 0x485   : > { %v2800_v61 = vpop.xlane.xlu0 %973  ;;  %v1124_v9 = vsel %vm1123_vm5, %v2726_v26, %v1120_v35  ;;  %vm1046_vm7 = vweird.f32 %v2668_v32  ;;  %vm1047_vm11 = vweird.f32 %v2768_v0  ;;  %v1175_v8 = vmul.f32 %v2493_v58, %v1174_v39 }
 0x486   : > { %2112 = vrcp.f32 %v2800_v61  ;;  %v1129_v48 = vsel %vm2816_vm15, %v1128_v20, %v1124_v9  ;;  %v1184_v21 = vsel %vm1183_vm9, %v2744_v27, %v1180_v38  ;;  %vm2859_vm15 = vmor %vm1241_vm8, %vm1242_vm12  ;;  %v1045_v57 = vadd.f32 %v2768_v0, %v1044_v43 }
 0x487   : > { %v1130_v26 = vmul.f32 %v2521_v24, %v1129_v48  ;;  %v1189_v15 = vsel %vm1186_vm3, %v1188_v40, %v1184_v21  ;;  %v1229_v58 = vsel %vm2848_vm2, %v2693_v59, %v1225_v41  ;;  %vm2868_vm4 = vcmp.eq.f32.partialorder %v1050_v45, 8.507059e+37  ;;  %vm1048_vm6 = vmor %vm1046_vm7, %vm1047_vm11 }
 0x488   : > { %v1190_v13 = vmul.f32 %v2523_v63, %v1189_v15  ;;  %v1053_v30 = vor.u32 1.1754944e-38, %v1052_v46  ;;  %v1244_v62 = vsel %vm2859_vm15, %v2700_v5, %v1240_v14  ;;  %v1314_v34 = vunpack.c.l.b16 %v1257_v50 }
 0x489   : > { %v1258_v17 = vpack.c.bf16 %v1130_v26, %v1130_v26  ;;  %v1398_v63 = vpack.c.b16 %v2706_v4, %v2647_v28  ;;  %v1261_v35 = vpack.c.bf16 %v1175_v8, %v1175_v8  ;;  %v1234_v55 = vsel %vm2808_vm10, %v2714_v12, %v1229_v58 }
 0x48a   : > { %v1262_v25 = vpack.c.bf16 %v1190_v13, %v1190_v13  ;;  %v1249_v5 = vsel %vm2812_vm13, %v2748_v56, %v1244_v62  ;;  %v1065_v11 = vand.u32 2147483647, %v2800_v61  ;;  %v1067_v49 = vand.u32 2147483648, %v2800_v61 }
 0x48b   : > { %v1315_v22 = vunpack.c.l.b16 %v1258_v17  ;;  %v1049_v32 = vsel %vm1048_vm6, %v2768_v0, %v1045_v57  ;;  %v1235_v12 = vmul.f32 %v2504_v23, %v1234_v55  ;;  %v1250_v1 = vmul.f32 %v2507_v10, %v1249_v5 }
 0x48c   : > { %v2113_v52 = vpop.eup %2112  ;;  %v1401_v27 = vpop.permute.xlu1 %1400  ;;  %v1356_v51 = vunpack.c.l.b16 %v1262_v25  ;;  %v1054_v60 = vsel %vm2868_vm4, %v1053_v30, %v1049_v32  ;;  %vm1061_vm12 = vweird.f32 %v2800_v61  ;;  %v1355_v31 = vunpack.c.l.b16 %v1261_v35 }
 0x48d   : > { %v1057_v53 = vmul.f32 %v2113_v52, %v2800_v61  ;;  %1419 = vmatpush.bf16.msra.mxu0 %v1401_v27  ;;  %v1317_v28 = vpack.c.b16 %v1315_v22, %v1314_v34  ;;  %vm1062_vm8 = vweird.f32 %v2113_v52  ;;  %v1055_v54 = vmul.f32 %v2519_v19, %v1054_v60 }
 0x48e   : > { %vm1063_vm10 = vmor %vm1061_vm12, %vm1062_vm8  ;;  %v1068_v38 = vor.u32 1.1754944e-38, %v1067_v49  ;;  %vm1066_vm13 = vcmp.eq.f32.partialorder %v1065_v11, 8.507059e+37  ;;  %v1358_v0 = vpack.c.b16 %v1356_v51, %v1355_v31  ;;  %v1265_v20 = vpack.c.bf16 %v1235_v12, %v1235_v12 }
 0x48f   : > { %v1058_v59 = vsub.f32 1.0, %v1057_v53  ;;  %1893 = vmatmul.msk.bf16.gmra.mxu2 %vm452_vm0, %v1317_v28  ;;  %v1266_v29 = vpack.c.bf16 %v1250_v1, %v1250_v1  ;;  %v1253_v40 = vpack.c.bf16 %v1055_v54, %v1055_v54  ;;  %2114 = vrcp.f32 %v2742_v42 }
 0x490   : > { %1896 = vmatmul.msk.bf16.vlgmr.msra.gmra.mxu0 %vm452_vm0, %v1398_v63  ;;  %v1396_v43 = vunpack.c.l.b16 %v1265_v20  ;;  %v1037_v47 = vand.u32 2147483648, %v2742_v42  ;;  %vm1031_vm5 = vweird.f32 %v2742_v42  ;;  %v1035_v8 = vand.u32 2147483647, %v2742_v42  ;;  %v1943_v20 = vld [vmem:[%s3035_s5 + $0x8] sm:$0xff] }
 0x491   : > { %v1059_v4 = vmul.f32 %v2113_v52, %v1058_v59  ;;  %v1397_v19 = vunpack.c.l.b16 %v1266_v29  ;;  %v1273_v9 = vunpack.c.l.b16 %v1253_v40  ;;  %v1942_v29 = vld [vmem:[%s3035_s5] sm:$0xff]  ;;  %vm1483_vm4 = vcmask 130048  }
 0x492   : > { %v1038_v57 = vor.u32 1.1754944e-38, %v1037_v47  ;;  %vm1036_vm3 = vcmp.eq.f32.partialorder %v1035_v8, 8.507059e+37  ;;  %vm1488_vm6 = vcmask 195584  }
 0x493   : > { %v1060_v56 = vadd.f32 %v2113_v52, %v1059_v4  ;;  %v1399_v45 = vpack.c.b16 %v1397_v19, %v1396_v43 }
 0x494   : > { %1895 = vmatmul.msk.bf16.gmra.mxu3 %vm452_vm0, %v1358_v0 }
 0x495   : > { %v1064_v41 = vsel %vm1063_vm10, %v2113_v52, %v1060_v56  ;;  %v2115_v46 = vpop.eup %2114 }
 0x496   : > { %v1069_v33 = vsel %vm1066_vm13, %v1068_v38, %v1064_v41  ;;  %v1027_v48 = vmul.f32 %v2115_v46, %v2742_v42  ;;  %vm1032_vm1 = vweird.f32 %v2115_v46 }
 0x497   : > { %v1070_v23 = vmul.f32 %v2537_v37, %v1069_v33  ;;  %v1278_v10 = vpop.permute.xlu0 %1277  ;;  %vm1033_vm9 = vmor %vm1031_vm5, %vm1032_vm1 }
 0x498   : > { %1296 = vmatpush.bf16.msrb.mxu1 %v1278_v10  ;;  %v1028_v37 = vsub.f32 1.0, %v1027_v48 }
 0x499   : > { %v1254_v61 = vpack.c.bf16 %v1070_v23, %v1070_v23 }
 0x49a   : > { %v1029_v26 = vmul.f32 %v2115_v46, %v1028_v37 }
 0x49b   : > { %v1274_v39 = vunpack.c.l.b16 %v1254_v61 }
 0x49c   : > { %v1030_v21 = vadd.f32 %v2115_v46, %v1029_v26  ;;  %1527 = vmatpush.bf16.msra.mxu1 %v1943_v20 }
 0x49d   : > { %v1276_v14 = vpack.c.b16 %v1274_v39, %v1273_v9 }
 0x49e   : > { %v1034_v52 = vsel %vm1033_vm9, %v2115_v46, %v1030_v21 }
 0x49f   : > { %v1039_v17 = vsel %vm1036_vm3, %v1038_v57, %v1034_v52 }
 0x4a0   : > { %1897 = vmatmul.msk.bf16.gmra.mxu0 %vm452_vm0, %v1399_v45  ;;  %v1040_v53 = vmul.f32 %v2533_v36, %v1039_v17  ;;  %1528 = vmatpush.bf16.msra.mxu1 %v1942_v29 }
 0x4a2   : > { %v1252_v25 = vpack.c.bf16 %v1040_v53, %v1040_v53 }
 0x4a4   : > { %v1272_v35 = vunpack.c.l.b16 %v1252_v25 }
 0x4b7   : > { %v965_v50 = vpop.xlane.xlu1 %964 }
 0x4b8   : > { %2116 = vrcp.f32 %v965_v50  ;;  %v1022_v13 = vand.u32 2147483648, %v965_v50  ;;  %v1020_v18 = vand.u32 2147483647, %v965_v50  ;;  %vm1016_vm7 = vweird.f32 %v965_v50 }
 0x4ba   : > { %v1023_v62 = vor.u32 1.1754944e-38, %v1022_v13  ;;  %vm1021_vm15 = vcmp.eq.f32.partialorder %v1020_v18, 8.507059e+37 }
 0x4be   : > { %v2117_v15 = vpop.eup %2116 }
 0x4bf   : > { %v1012_v24 = vmul.f32 %v2117_v15, %v965_v50  ;;  %vm1017_vm2 = vweird.f32 %v2117_v15 }
 0x4c0   : > { %vm1018_vm11 = vmor %vm1016_vm7, %vm1017_vm2 }
 0x4c1   : > { %v1013_v27 = vsub.f32 1.0, %v1012_v24 }
 0x4c3   : > { %v1014_v58 = vmul.f32 %v2117_v15, %v1013_v27 }
 0x4c5   : > { %v1015_v30 = vadd.f32 %v2117_v15, %v1014_v58 }
 0x4c7   : > { %v1019_v34 = vsel %vm1018_vm11, %v2117_v15, %v1015_v30 }
 0x4c8   : > { %v1024_v42 = vsel %vm1021_vm15, %v1023_v62, %v1019_v34  ;;  %vm1803_vm15 = vcmask 257024  }
 0x4c9   : > { %v1025_v22 = vmul.f32 %v2549_v44, %v1024_v42 }
 0x4cb   : > { %v1251_v63 = vpack.c.bf16 %v1025_v22, %v1025_v22 }
 0x4cd   : > { %v1271_v59 = vunpack.c.l.b16 %v1251_v63 }
 0x4cf   : > { %v1275_v55 = vpack.c.b16 %v1272_v35, %v1271_v59  ;;  %v2039_v59 = vld [vmem:[%s3036_s6] ss:$0 sm:$0xff] }
 0x4d1   : > { %1890 = vmatmul.msk.bf16.vlgmr.msrb.gmra.mxu1 %vm452_vm0, %v1275_v55 }
 0x4e1   : > { %1891 = vmatmul.msk.bf16.gmra.mxu1 %vm452_vm0, %v1276_v14 }
 0x501   : > { %v1339_v5 = vpop.f32.mrf.mxu2 }
 0x507   : > { %v1380_v11 = vpop.f32.mrf.mxu3 }
 0x509   : > { %v1341_v36 = vpop.f32.mrf.mxu2 }
 0x50a   : > { %v2006_v28 = vpack.i.bf16 %v1341_v36, %v1339_v5 }
 0x50c   : > { %2007 = vrot.lane.b32.xlu1 %v2006_v28, %s2148_s15 }
 0x50d   : > { %v1421_v49 = vpop.f32.mrf.mxu0 }
 0x50f   : > { %v1382_v32 = vpop.f32.mrf.mxu3 }
 0x510   : > { %v2011_v4 = vpack.i.bf16 %v1382_v32, %v1380_v11 }
 0x512   : > { %2012 = vrot.lane.b32.xlu0 %v2011_v4, %s2149_s16  ;;  %v1344_v60 = vpop.f32.mrf.mxu2 }
 0x515   : > { %v1423_v51 = vpop.f32.mrf.mxu0 }
 0x516   : > { %v2016_v44 = vpack.i.bf16 %v1423_v51, %v1421_v49 }
 0x517   : > { %v1385_v12 = vpop.f32.mrf.mxu3 }
 0x518   : > { %2017 = vrot.lane.b32.xlu2 %v2016_v44, %s2150_s17 }
 0x51a   : > { %v1346_v56 = vpop.f32.mrf.mxu2 }
 0x51b   : > { %v2021_v31 = vpack.i.bf16 %v1346_v56, %v1344_v60 }
 0x51d   : > { %v1426_v1 = vpop.f32.mrf.mxu0  ;;  %2022 = vrot.lane.b32.xlu0 %v2021_v31, %s2148_s15 }
 0x51f   : > { %v1387_v54 = vpop.f32.mrf.mxu3 }
 0x520   : > { %v2026_v38 = vpack.i.bf16 %v1387_v54, %v1385_v12 }
 0x522   : > { %2027 = vrot.lane.b32.xlu2 %v2026_v38, %s2149_s16 }
 0x525   : > { %v1428_v0 = vpop.f32.mrf.mxu0 }
 0x526   : > { %v2031_v41 = vpack.i.bf16 %v1428_v0, %v1426_v1 }
 0x528   : > { %2032 = vrot.lane.b32.xlu0 %v2031_v41, %s2150_s17 }
 0x54e   : > { %v1298_v33 = vpop.f32.mrf.mxu1 }
 0x556   : > { %v1300_v40 = vpop.f32.mrf.mxu1 }
 0x55e   : > { %v1303_v8 = vpop.f32.mrf.mxu1 }
 0x566   : > { %v1305_v27 = vpop.f32.mrf.mxu1 }
 0x572   : > { %v2018_v43 = vpop.permute.xlu2 %2017 }
 0x573   : > { %v2020_v14 = vunpack.i.h.bf16 %v2018_v43  ;;  %v2019_v45 = vunpack.i.l.bf16 %v2018_v43 }
 0x57c   : > { %v2028_v57 = vpop.permute.xlu2 %2027 }
 0x57d   : > { %v2030_v58 = vunpack.i.h.bf16 %v2028_v57  ;;  %v2029_v18 = vunpack.i.l.bf16 %v2028_v57 }
 0x57e   : > { %v2008_v23 = vpop.permute.xlu1 %2007 }
 0x57f   : > { %v2010_v10 = vunpack.i.h.bf16 %v2008_v23  ;;  %v2009_v61 = vunpack.i.l.bf16 %v2008_v23 }
 0x581   : > { %v1479_v46 = vsel %vm679_vm14, %v1298_v33, %v2009_v61  ;;  %v1480_v48 = vsel %vm679_vm14, %v1300_v40, %v2010_v10 }
 0x584   : > { %v2013_v19 = vpop.permute.xlu0 %2012 }
 0x585   : > { %v2015_v9 = vunpack.i.h.bf16 %v2013_v19  ;;  %v2014_v39 = vunpack.i.l.bf16 %v2013_v19 }
 0x587   : > { %v1484_v37 = vsel %vm1483_vm4, %v1479_v46, %v2014_v39  ;;  %v1485_v26 = vsel %vm1483_vm4, %v1480_v48, %v2015_v9 }
 0x588   : > { %v1489_v50 = vsel %vm1488_vm6, %v1484_v37, %v2019_v45  ;;  %v1490_v21 = vsel %vm1488_vm6, %v1485_v26, %v2020_v14  ;;  %v1945_v37 = vld [vmem:[%s3039_s9 + $0x8] sm:$0xff] }
 0x589   : > { %v1493_v47 = vpack.c.bf16 %v1490_v21, %v1489_v50  ;;  %1682 = vmatpush.bf16.msra.mxu2 %v1945_v37 }
 0x58b   : > { %1906 = vmatmul.msk.bf16.vlgmr.msra.gmra.mxu1 %vm452_vm0, %v1493_v47 }
 0x58f   : > { %v2023_v15 = vpop.permute.xlu0 %2022 }
 0x590   : > { %v2025_v52 = vunpack.i.h.bf16 %v2023_v15  ;;  %v2024_v24 = vunpack.i.l.bf16 %v2023_v15 }
 0x592   : > { %v1481_v17 = vsel %vm679_vm14, %v1303_v8, %v2024_v24  ;;  %v1482_v13 = vsel %vm679_vm14, %v1305_v27, %v2025_v52  ;;  %v1944_v8 = vld [vmem:[%s3039_s9] sm:$0xff] }
 0x593   : > { %v1486_v34 = vsel %vm1483_vm4, %v1481_v17, %v2029_v18  ;;  %v1487_v42 = vsel %vm1483_vm4, %v1482_v13, %v2030_v58  ;;  %1683 = vmatpush.bf16.msra.mxu2 %v1944_v8 }
 0x59a   : > { %v2033_v30 = vpop.permute.xlu0 %2032 }
 0x59b   : > { %v2035_v53 = vunpack.i.h.bf16 %v2033_v30  ;;  %v2034_v62 = vunpack.i.l.bf16 %v2033_v30 }
 0x59d   : > { %v1491_v22 = vsel %vm1488_vm6, %v1486_v34, %v2034_v62  ;;  %v1492_v25 = vsel %vm1488_vm6, %v1487_v42, %v2035_v53 }
 0x59e   : > { %v1494_v63 = vpack.c.bf16 %v1492_v25, %v1491_v22  ;;  %v2040_v25 = vld [vmem:[%s3037_s7] ss:$0 sm:$0xff] }
 0x5a0   : > { %1907 = vmatmul.msk.bf16.gmra.mxu1 %vm452_vm0, %v1494_v63 }
 0x608   : > { %v1530_v35 = vpop.f32.mrf.mxu1 }
 0x609   : > { %v1531_v55 = vadd.f32 %v2039_v59, %v1530_v35 }
 0x60b   : > { %v2935_v5 = vadd.f32 %v2239_v3, %v1531_v55 }
 0x60d   : > { %v1546_v11 = vsel %vm452_vm0, %v2935_v5, 0.0 }
 0x60e   : > { %1547 = vadd.xlane.f32.xlu2 %v1546_v11 }
 0x610   : > { %v1532_v49 = vpop.f32.mrf.mxu1 }
 0x611   : > { %v1533_v36 = vadd.f32 %v2039_v59, %v1532_v49 }
 0x613   : > { %v2940_v28 = vadd.f32 %v2247_v7, %v1533_v36 }
 0x615   : > { %v1549_v32 = vsel %vm452_vm0, %v2940_v28, 0.0 }
 0x616   : > { %1550 = vadd.xlane.f32.xlu1 %v1549_v32  ;;  %v2041_v32 = vld [vmem:[%s3038_s8] ss:$0 sm:$0xff] }
 0x61d   : > { %v1535_v4 = vpop.f32.mrf.mxu1 }
 0x61e   : > { %v1536_v51 = vadd.f32 %v2039_v59, %v1535_v4 }
 0x620   : > { %v2945_v44 = vadd.f32 %v2237_v2, %v1536_v51 }
 0x622   : > { %v1552_v3 = vsel %vm452_vm0, %v2945_v44, 0.0 }
 0x623   : > { %1553 = vadd.xlane.f32.xlu0 %v1552_v3 }
 0x625   : > { %v1537_v60 = vpop.f32.mrf.mxu1 }
 0x626   : > { %v1538_v12 = vadd.f32 %v2039_v59, %v1537_v60 }
 0x628   : > { %v2950_v1 = vadd.f32 %v2245_v6, %v1538_v12 }
 0x62a   : > { %v1555_v7 = vsel %vm452_vm0, %v2950_v1, 0.0 }
 0x62b   : > { %1556 = vadd.xlane.f32.xlu2 %v1555_v7 }
 0x681   : > { %v1548_v56 = vpop.xlane.xlu2 %1547 }
 0x682   : > { %v1558_v31 = vmul.f32 %v1548_v56, %v2253_v16 }
 0x684   : > { %v1562_v54 = vsub.f32 %v2935_v5, %v1558_v31 }
 0x686   : > { %v1566_v2 = vmul.f32 %v1562_v54, %v1562_v54 }
 0x688   : > { %v1570_v38 = vsel %vm452_vm0, %v1566_v2, 0.0 }
 0x689   : > { %v1551_v0 = vpop.xlane.xlu1 %1550  ;;  %1571 = vadd.xlane.f32.xlu1 %v1570_v38 }
 0x68a   : > { %v1559_v41 = vmul.f32 %v1551_v0, %v2253_v16 }
 0x68c   : > { %v1563_v20 = vsub.f32 %v2940_v28, %v1559_v41 }
 0x68e   : > { %v1567_v6 = vmul.f32 %v1563_v20, %v1563_v20 }
 0x690   : > { %v1573_v29 = vsel %vm452_vm0, %v1567_v6, 0.0 }
 0x691   : > { %1574 = vadd.xlane.f32.xlu0 %v1573_v29 }
 0x696   : > { %v1554_v33 = vpop.xlane.xlu0 %1553 }
 0x697   : > { %v1560_v23 = vmul.f32 %v1554_v33, %v2253_v16 }
 0x699   : > { %v2962_v40 = vsub.f32 %v2945_v44, %v1560_v23 }
 0x69b   : > { %v1568_v10 = vmul.f32 %v2962_v40, %v2962_v40 }
 0x69d   : > { %v1576_v61 = vsel %vm452_vm0, %v1568_v10, 0.0 }
 0x69e   : > { %1577 = vadd.xlane.f32.xlu2 %v1576_v61  ;;  %v1557_v43 = vpop.xlane.xlu2 %1556 }
 0x69f   : > { %v1561_v19 = vmul.f32 %v1557_v43, %v2253_v16 }
 0x6a1   : > { %v2969_v9 = vsub.f32 %v2950_v1, %v1561_v19 }
 0x6a3   : > { %v1569_v39 = vmul.f32 %v2969_v9, %v2969_v9 }
 0x6a5   : > { %v1579_v14 = vsel %vm452_vm0, %v1569_v39, 0.0 }
 0x6a6   : > { %1580 = vadd.xlane.f32.xlu1 %v1579_v14 }
 0x6fc   : > { %v1572_v45 = vpop.xlane.xlu1 %1571 }
 0x6fd   : > { %v1582_v46 = vmul.f32 %v1572_v45, %v2253_v16  ;;  %v1949_v45 = vld [vmem:[%s3041_s11 + $0x18] sm:$0xff] }
 0x6fe   : > { %1780 = vmatpush.bf16.msra.mxu3 %v1949_v45 }
 0x6ff   : > { %v1586_v48 = vadd.f32 1e-05, %v1582_v46 }
 0x701   : > { %2118 = vrsqrt.f32 %v1586_v48  ;;  %vm1596_vm8 = vweird.f32 %v1586_v48 }
 0x704   : > { %v1575_v26 = vpop.xlane.xlu0 %1574 }
 0x705   : > { %v1583_v50 = vmul.f32 %v1575_v26, %v2253_v16 }
 0x707   : > { %v2119_v21 = vpop.eup %2118  ;;  %v1587_v47 = vadd.f32 1e-05, %v1583_v50  ;;  %v1946_v50 = vld [vmem:[%s3041_s11] sm:$0xff] }
 0x708   : > { %v1591_v15 = vmul.f32 %v2119_v21, %v1586_v48  ;;  %vm1597_vm14 = vweird.f32 %v2119_v21  ;;  %v1947_v48 = vld [vmem:[%s3041_s11 + $0x8] sm:$0xff] }
 0x709   : > { %2120 = vrsqrt.f32 %v1587_v47  ;;  %vm1598_vm12 = vmor %vm1596_vm8, %vm1597_vm14  ;;  %vm1606_vm13 = vweird.f32 %v1587_v47 }
 0x70a   : > { %v1592_v52 = vmul.f32 %v2119_v21, %v1591_v15 }
 0x70c   : > { %v1593_v24 = vmul.f32 0.5, %v1592_v52 }
 0x70e   : > { %v1594_v57 = vsub.f32 1.5, %v1593_v24 }
 0x70f   : > { %v2121_v17 = vpop.eup %2120 }
 0x710   : > { %v1595_v58 = vmul.f32 %v2119_v21, %v1594_v57  ;;  %v1601_v18 = vmul.f32 %v2121_v17, %v1587_v47  ;;  %vm1607_vm10 = vweird.f32 %v2121_v17 }
 0x711   : > { %v1578_v27 = vpop.xlane.xlu2 %1577  ;;  %vm1608_vm1 = vmor %vm1606_vm13, %vm1607_vm10 }
 0x712   : > { %v1584_v13 = vmul.f32 %v1578_v27, %v2253_v16  ;;  %v1602_v53 = vmul.f32 %v2121_v17, %v1601_v18  ;;  %v1599_v62 = vsel %vm1598_vm12, %v2119_v21, %v1595_v58 }
 0x713   : > { %v1630_v63 = vmul.f32 %v1599_v62, %v1562_v54 }
 0x714   : > { %v1588_v30 = vadd.f32 1e-05, %v1584_v13  ;;  %v1603_v34 = vmul.f32 0.5, %v1602_v53 }
 0x715   : > { %v1637_v4 = vmul.f32 %v2040_v25, %v1630_v63 }
 0x716   : > { %2122 = vrsqrt.f32 %v1588_v30  ;;  %v1604_v42 = vsub.f32 1.5, %v1603_v34  ;;  %vm1616_vm9 = vweird.f32 %v1588_v30 }
 0x717   : > { %v1644_v7 = vadd.f32 %v2041_v32, %v1637_v4 }
 0x718   : > { %v1605_v35 = vmul.f32 %v2121_v17, %v1604_v42 }
 0x719   : > { %v1581_v22 = vpop.xlane.xlu1 %1580 }
 0x71a   : > { %v1585_v59 = vmul.f32 %v1581_v22, %v2253_v16  ;;  %v1609_v49 = vsel %vm1608_vm1, %v2121_v17, %v1605_v35 }
 0x71b   : > { %v1631_v51 = vmul.f32 %v1609_v49, %v1563_v20 }
 0x71c   : > { %v2123_v55 = vpop.eup %2122  ;;  %v1589_v11 = vadd.f32 1e-05, %v1585_v59 }
 0x71d   : > { %v1611_v36 = vmul.f32 %v2123_v55, %v1588_v30  ;;  %v1638_v60 = vmul.f32 %v2040_v25, %v1631_v51  ;;  %vm1617_vm5 = vweird.f32 %v2123_v55 }
 0x71e   : > { %2124 = vrsqrt.f32 %v1589_v11  ;;  %vm1618_vm3 = vmor %vm1616_vm9, %vm1617_vm5  ;;  %vm1626_vm7 = vweird.f32 %v1589_v11 }
 0x71f   : > { %v1612_v3 = vmul.f32 %v2123_v55, %v1611_v36  ;;  %v1645_v56 = vadd.f32 %v2041_v32, %v1638_v60 }
 0x721   : > { %v1613_v12 = vmul.f32 0.5, %v1612_v3  ;;  %v1648_v54 = vpack.c.bf16 %v1645_v56, %v1644_v7 }
 0x723   : > { %v1614_v16 = vsub.f32 1.5, %v1613_v12  ;;  %1916 = vmatmul.msk.bf16.vlgmr.msra.gmra.mxu2 %vm452_vm0, %v1648_v54 }
 0x724   : > { %v2125_v31 = vpop.eup %2124 }
 0x725   : > { %v1615_v2 = vmul.f32 %v2123_v55, %v1614_v16  ;;  %v1621_v38 = vmul.f32 %v2125_v31, %v1589_v11  ;;  %vm1627_vm2 = vweird.f32 %v2125_v31 }
 0x726   : > { %vm1628_vm11 = vmor %vm1626_vm7, %vm1627_vm2 }
 0x727   : > { %v1622_v0 = vmul.f32 %v2125_v31, %v1621_v38  ;;  %v1619_v41 = vsel %vm1618_vm3, %v2123_v55, %v1615_v2 }
 0x728   : > { %v1632_v29 = vmul.f32 %v1619_v41, %v2962_v40  ;;  %v2042_v40 = vld [vmem:[%s3040_s10] ss:$0 sm:$0xff] }
 0x729   : > { %v1623_v6 = vmul.f32 0.5, %v1622_v0 }
 0x72a   : > { %v1639_v61 = vmul.f32 %v2040_v25, %v1632_v29  ;;  %v2043_v29 = vld [vmem:[%s3042_s12] ss:$0 sm:$0xff] }
 0x72b   : > { %v1624_v20 = vsub.f32 1.5, %v1623_v6 }
 0x72c   : > { %v1646_v19 = vadd.f32 %v2041_v32, %v1639_v61 }
 0x72d   : > { %v1625_v33 = vmul.f32 %v2125_v31, %v1624_v20 }
 0x72f   : > { %v1629_v23 = vsel %vm1628_vm11, %v2125_v31, %v1625_v33 }
 0x730   : > { %v1633_v10 = vmul.f32 %v1629_v23, %v2969_v9  ;;  %v1948_v9 = vld [vmem:[%s3041_s11 + $0x10] sm:$0xff] }
 0x731   : > { %1781 = vmatpush.bf16.msra.mxu3 %v1948_v9 }
 0x732   : > { %v1640_v43 = vmul.f32 %v2040_v25, %v1633_v10 }
 0x734   : > { %v1647_v39 = vadd.f32 %v2041_v32, %v1640_v43 }
 0x735   : > { %1782 = vmatpush.bf16.msra.mxu3 %v1947_v48 }
 0x736   : > { %v1649_v14 = vpack.c.bf16 %v1647_v39, %v1646_v19 }
 0x738   : > { %1917 = vmatmul.msk.bf16.gmra.mxu2 %vm452_vm0, %v1649_v14  ;;  %vm1769_vm0 = vcmask 523264  }
 0x739   : > { %1783 = vmatpush.bf16.msra.mxu3 %v1946_v50 }
 0x7a6   : > { %v1685_v46 = vpop.f32.mrf.mxu2 }
 0x7a7   : > { %v1686_v37 = vadd.f32 %v2042_v40, %v1685_v46 }
 0x7a9   : > { %v1699_v26 = vmul.f32 %v1686_v37, %v1686_v37  ;;  %v1695_v55 = vmul.f32 0.5, %v1686_v37 }
 0x7ab   : > { %v1703_v21 = vmul.f32 %v1699_v26, %v1686_v37 }
 0x7ad   : > { %v1707_v47 = vmul.f32 0.044715, %v1703_v21 }
 0x7ae   : > { %v1687_v8 = vpop.f32.mrf.mxu2 }
 0x7af   : > { %v1711_v15 = vadd.f32 %v1707_v47, %v1686_v37  ;;  %v1688_v52 = vadd.f32 %v2042_v40, %v1687_v8 }
 0x7b1   : > { %v1700_v24 = vmul.f32 %v1688_v52, %v1688_v52  ;;  %v1715_v57 = vmul.f32 0.7978846, %v1711_v15  ;;  %v1696_v11 = vmul.f32 0.5, %v1688_v52 }
 0x7b3   : > { %v1704_v27 = vmul.f32 %v1700_v24, %v1688_v52  ;;  %2126 = vtanh.f32 %v1715_v57 }
 0x7b5   : > { %v1708_v17 = vmul.f32 0.044715, %v1704_v27 }
 0x7b7   : > { %v1712_v13 = vadd.f32 %v1708_v17, %v1688_v52 }
 0x7b9   : > { %v1716_v18 = vmul.f32 0.7978846, %v1712_v13  ;;  %v2127_v62 = vpop.eup %2126 }
 0x7ba   : > { %v1723_v22 = vadd.f32 1.0, %v2127_v62 }
 0x7bb   : > { %v1690_v58 = vpop.f32.mrf.mxu2  ;;  %2128 = vtanh.f32 %v1716_v18 }
 0x7bc   : > { %v1691_v30 = vadd.f32 %v2042_v40, %v1690_v58  ;;  %v1727_v32 = vmul.f32 %v1723_v22, %v1695_v55 }
 0x7be   : > { %v1701_v53 = vmul.f32 %v1691_v30, %v1691_v30  ;;  %v1697_v2 = vmul.f32 0.5, %v1691_v30 }
 0x7c0   : > { %v1705_v34 = vmul.f32 %v1701_v53, %v1691_v30 }
 0x7c1   : > { %v2129_v63 = vpop.eup %2128 }
 0x7c2   : > { %v1709_v42 = vmul.f32 0.044715, %v1705_v34  ;;  %v1724_v49 = vadd.f32 1.0, %v2129_v63 }
 0x7c3   : > { %v1692_v25 = vpop.f32.mrf.mxu2 }
 0x7c4   : > { %v1713_v59 = vadd.f32 %v1709_v42, %v1691_v30  ;;  %v1693_v35 = vadd.f32 %v2042_v40, %v1692_v25  ;;  %v1728_v4 = vmul.f32 %v1724_v49, %v1696_v11 }
 0x7c6   : > { %v1702_v36 = vmul.f32 %v1693_v35, %v1693_v35  ;;  %v1717_v51 = vmul.f32 0.7978846, %v1713_v59  ;;  %v1731_v60 = vpack.c.bf16 %v1728_v4, %v1727_v32  ;;  %v1698_v38 = vmul.f32 0.5, %v1693_v35 }
 0x7c8   : > { %v1706_v3 = vmul.f32 %v1702_v36, %v1693_v35  ;;  %1934 = vmatmul.msk.bf16.vlgmr.msra.gmra.mxu3 %vm1769_vm0, %v1731_v60  ;;  %2130 = vtanh.f32 %v1717_v51 }
 0x7ca   : > { %v1710_v12 = vmul.f32 0.044715, %v1706_v3 }
 0x7cc   : > { %v1714_v7 = vadd.f32 %v1710_v12, %v1693_v35 }
 0x7ce   : > { %v1718_v56 = vmul.f32 0.7978846, %v1714_v7  ;;  %v2131_v16 = vpop.eup %2130 }
 0x7cf   : > { %v1725_v31 = vadd.f32 1.0, %v2131_v16 }
 0x7d0   : > { %2132 = vtanh.f32 %v1718_v56 }
 0x7d1   : > { %v1729_v41 = vmul.f32 %v1725_v31, %v1697_v2 }
 0x7d6   : > { %v2133_v54 = vpop.eup %2132 }
 0x7d7   : > { %v1726_v0 = vadd.f32 1.0, %v2133_v54 }
 0x7d9   : > { %v1730_v6 = vmul.f32 %v1726_v0, %v1698_v38 }
 0x7db   : > { %v1732_v20 = vpack.c.bf16 %v1730_v6, %v1729_v41 }
 0x7dd   : > { %1935 = vmatmul.msk.bf16.gmra.mxu3 %vm1769_vm0, %v1732_v20 }
 0x84b   : > { %v1785_v33 = vpop.f32.mrf.mxu3 }
 0x84c   : > { %v1786_v23 = vadd.f32 %v2043_v29, %v1785_v33 }
 0x84e   : > { %v1795_v10 = vadd.f32 %v1786_v23, %v2935_v5 }
 0x850   : > { %v1799_v61 = vpack.c.bf16 %v1795_v10, %v1795_v10 }
 0x852   : > { %1804 = vst.msk [vmem:[%s440_s18] sm:$0xf] %vm1803_vm15, %v1799_v61 }
 0x853   : > { %v1787_v43 = vpop.f32.mrf.mxu3 }
 0x854   : > { %v1788_v19 = vadd.f32 %v2043_v29, %v1787_v43 }
 0x856   : > { %v1796_v39 = vadd.f32 %v1788_v19, %v2940_v28 }
 0x858   : > { %v1800_v14 = vpack.c.bf16 %v1796_v39, %v1796_v39 }
 0x85a   : > { %1805 = vst.msk [vmem:[%s440_s18 + $0x4] sm:$0xf] %vm1803_vm15, %v1800_v14 }
 0x860   : > { %v1790_v45 = vpop.f32.mrf.mxu3 }
 0x861   : > { %v1791_v40 = vadd.f32 %v2043_v29, %v1790_v45 }
 0x863   : > { %v1797_v5 = vadd.f32 %v1791_v40, %v2945_v44 }
 0x865   : > { %v1801_v9 = vpack.c.bf16 %v1797_v5, %v1797_v5 }
 0x867   : > { %1806 = vst.msk [vmem:[%s440_s18 + $0x8] sm:$0xf] %vm1803_vm15, %v1801_v9 }
 0x868   : > { %v1792_v46 = vpop.f32.mrf.mxu3 }
 0x869   : > { %v1793_v48 = vadd.f32 %v2043_v29, %v1792_v46 }
 0x86b   : > { %v1798_v37 = vadd.f32 %v1793_v48, %v2950_v1 }
 0x86d   : > { %v1802_v26 = vpack.c.bf16 %v1798_v37, %v1798_v37 }
 0x86f   : > { %1807 = vst.msk [vmem:[%s440_s18 + $0xc] sm:$0xf] %vm1803_vm15, %v1802_v26 }
 0x870 PF: > { %s23_s25 = sadd.s32 1, %s2140_s25  }
 0x871   : > { %p20_p4 = scmp.ge.s32.totalorder %s23_s25, 4  }
 0x873   :  { %22 = sbr.rel (!%p20_p4) target bundleno = 1 (0x1), region = 102 }

</bundles_post_ra>
